<compile_context>
chip_gen: v6e
topology: v6e:2x2x1
jax: 0.10.0
libtpu: 0.0.40
codegen_flags: <defaults>
</compile_context>

<pallas_src>
import functools
import math

import jax
import jax.numpy as jnp
from jax.experimental import pallas as pl
from jax.experimental.pallas import tpu as pltpu


# ---------------------------------------------------------------------------
# Fused kernel
# ---------------------------------------------------------------------------

def _cross_attention_kernel(
    # inputs
    q_ref,        # (1, TQ, dim_q)  bf16
    k_ref,        # (1, Nk, dim_k)  bf16
    v_ref,        # (1, Nk, D)      bf16
    wqp_ref,      # (D, dim_q)      bf16  query_proj weight
    bqp_ref,      # (1, D)          f32   query_proj bias
    wkp_ref,      # (D, dim_k)      bf16  key_proj weight
    bkp_ref,      # (1, D)          f32   key_proj bias
    wq_ref,       # (1, D, D)       bf16  layer-l fc_q
    wk_ref,       # (1, D, D)       bf16  layer-l fc_k (pre-scaled by 1/sqrt(D))
    wv_ref,       # (1, D, D)       bf16  layer-l fc_v
    wo_ref,       # (1, D, D)       bf16  layer-l fc_o
    # outputs
    o_ref,        # (1, TQ, D)      f32
    # scratch
    q_state,      # (NQT*TQ, D) f32   activation carried across layers
    kproj_state,  # (Nk, D)     bf16  key_proj(K), computed once per batch
    kh_state,     # (H, Nk, ds) bf16  fc_k heads, computed once per (b, layer)
    vh_state,     # (H, Nk, ds) bf16  fc_v heads, computed once per (b, layer)
    *, num_heads, head_dim, q_tile):
  f32 = jnp.float32
  bf16 = jnp.bfloat16
  H, ds, TQ = num_heads, head_dim, q_tile
  layer = pl.program_id(1)
  qi = pl.program_id(2)

  def mm_nt(a, b):
    # a: (M, K), b: (N, K) -> (M, N). Weights are stored (out, in) like
    # torch.nn.Linear, so contract dim 1 of both: no in-kernel transpose.
    return jax.lax.dot_general(
        a, b, dimension_numbers=(((1,), (1,)), ((), ())),
        preferred_element_type=f32)

  def split_heads(y):
    # (N, H*ds) -> (H, N, ds); head h <-> features [h*ds, (h+1)*ds).
    # Pure data movement (static lane slices) on the copy/XLU path.
    return jnp.stack([y[:, h * ds:(h + 1) * ds] for h in range(H)], axis=0)

  def merge_heads(y):
    # (H, N, ds) -> (N, H*ds), inverse of split_heads (lane concat).
    return jnp.concatenate([y[h] for h in range(H)], axis=-1)

  # ---- Key-side work, hoisted out of the query-tile axis -----------------
  @pl.when(jnp.logical_and(layer == 0, qi == 0))
  def _():
    # key_proj(K) + bias, once per batch element; kept in bf16 (only ever a
    # bf16 matmul operand).
    kproj_state[...] = (mm_nt(k_ref[0], wkp_ref[...])
                        + bkp_ref[...]).astype(bf16)

  @pl.when(qi == 0)
  def _():
    # fc_k / fc_v of this layer, once per (batch, layer), stored per-head.
    # Full-width (Nk, D) x (D, D) lane-dense matmuls; head split afterwards.
    kh_state[...] = split_heads(
        mm_nt(kproj_state[...], wk_ref[0])).astype(bf16)
    vh_state[...] = split_heads(
        mm_nt(v_ref[0], wv_ref[0])).astype(bf16)

  # ---- Query-side, per (layer, q_tile) ------------------------------------
  rows = pl.ds(pl.multiple_of(qi * TQ, TQ), TQ)

  @pl.when(layer == 0)
  def _():
    # Fold query_proj into the first layer step of each query tile.
    q_state[rows, :] = mm_nt(q_ref[0], wqp_ref[...]) + bqp_ref[...]

  x = q_state[rows, :]                                 # (TQ, D) f32 layer input

  qp = mm_nt(x.astype(bf16), wq_ref[0])                # fc_q, full width (TQ, D)
  qh = split_heads(qp)                                 # (H, TQ, ds)

  # Scores + softmax over keys (f32). The 1/sqrt(D) scale is already folded
  # into wk in the wrapper, so no scaling pass over the (H, TQ, Nk) tensor.
  s = jnp.einsum('hqe,hke->hqk', qh.astype(bf16), kh_state[...],
                 preferred_element_type=f32)
  m = jnp.max(s, axis=-1, keepdims=True)
  p = jnp.exp(s - m)
  p = p * pl.reciprocal(jnp.sum(p, axis=-1, keepdims=True), approx=True)

  attn = jnp.einsum('hqk,hke->hqe', p.astype(bf16), vh_state[...],
                    preferred_element_type=f32)        # (H, TQ, ds)

  o1 = qp + merge_heads(attn)                          # residual with fc_q(X)
  fco = mm_nt(o1.astype(bf16), wo_ref[0])              # fc_o, full width
  o2 = o1 + jnp.maximum(fco, 0.0)                      # + ReLU(fc_o(O))

  q_state[rows, :] = o2                                # carried to next layer

  @pl.when(layer == pl.num_programs(1) - 1)
  def _():
    # Only the last layer's value is the module output.
    o_ref[0] = o2.astype(o_ref.dtype)


# ---------------------------------------------------------------------------
# Wrapper
# ---------------------------------------------------------------------------

def cross_attention_forward(params, Q, K, V, num_heads, *, q_block=256):
  B, Nq, dim_q = Q.shape
  _, Nk, dim_k = K.shape
  D = V.shape[-1]
  L = len(params["layers"])
  H = num_heads
  assert D % H == 0
  ds = D // H

  bf16, f32 = jnp.bfloat16, jnp.float32

  def stack(name):
    return jnp.stack([lyr[name] for lyr in params["layers"]])

  wq_s = stack("wq").astype(bf16)                                 # (L, D, D)
  # Fold the 1/sqrt(D) softmax scale into fc_k (its output only feeds the
  # score matmul, never the residual), so the kernel never scales scores.
  wk_s = (stack("wk") * (1.0 / math.sqrt(D))).astype(bf16)        # (L, D, D)
  wv_s = stack("wv").astype(bf16)                                 # (L, D, D)
  wo_s = stack("wo").astype(bf16)                                 # (L, D, D)

  wqp = params["wq_proj"].astype(bf16)                            # (D, dim_q)
  wkp = params["wk_proj"].astype(bf16)                            # (D, dim_k)
  bqp = params["bq_proj"].reshape(1, D).astype(f32)
  bkp = params["bk_proj"].reshape(1, D).astype(f32)

  # Query-tile size: prefer multiples of 256 for MXU fill on v6e/v7x; the
  # whole Nq when it is small.
  TQ = Nq if Nq <= q_block else q_block
  n_q_tiles = pl.cdiv(Nq, TQ)
  # Grid: (batch, layer, q_tile). layer/q_tile are sequential ("arbitrary")
  # because of the carried q_state and the qi==0 key-side scratch init; only
  # the batch axis is megacore-parallel.
  grid = (B, L, n_q_tiles)

  # Explicit scoped-VMEM budget, capped per generation (v7x has 64 MiB
  # physical per TensorCore; v5e/v6e have 128 MiB).
  vmem_limit = 48 * 1024 * 1024
  try:
    cap = getattr(pltpu.get_tpu_info(), "vmem_capacity_bytes", None)
    if cap:
      vmem_limit = min(vmem_limit, (5 * int(cap)) // 8)
  except Exception:
    pass

  kern = functools.partial(_cross_attention_kernel,
                           num_heads=H, head_dim=ds, q_tile=TQ)

  return pl.pallas_call(
      kern,
      out_shape=jax.ShapeDtypeStruct((B, Nq, D), f32),
      grid=grid,
      in_specs=[
          pl.BlockSpec((1, TQ, dim_q), lambda b, l, qi: (b, qi, 0)),
          pl.BlockSpec((1, Nk, dim_k), lambda b, l, qi: (b, 0, 0)),
          pl.BlockSpec((1, Nk, D), lambda b, l, qi: (b, 0, 0)),
          pl.BlockSpec((D, dim_q), lambda b, l, qi: (0, 0)),
          pl.BlockSpec((1, D), lambda b, l, qi: (0, 0)),
          pl.BlockSpec((D, dim_k), lambda b, l, qi: (0, 0)),
          pl.BlockSpec((1, D), lambda b, l, qi: (0, 0)),
          pl.BlockSpec((1, D, D), lambda b, l, qi: (l, 0, 0)),
          pl.BlockSpec((1, D, D), lambda b, l, qi: (l, 0, 0)),
          pl.BlockSpec((1, D, D), lambda b, l, qi: (l, 0, 0)),
          pl.BlockSpec((1, D, D), lambda b, l, qi: (l, 0, 0)),
      ],
      out_specs=pl.BlockSpec((1, TQ, D), lambda b, l, qi: (b, qi, 0)),
      scratch_shapes=[
          pltpu.VMEM((n_q_tiles * TQ, D), f32),  # activation across layers
          pltpu.VMEM((Nk, D), bf16),             # key_proj(K)
          pltpu.VMEM((H, Nk, ds), bf16),         # fc_k heads, per (b, layer)
          pltpu.VMEM((H, Nk, ds), bf16),         # fc_v heads, per (b, layer)
      ],
      compiler_params=pltpu.CompilerParams(
          dimension_semantics=("parallel", "arbitrary", "arbitrary"),
          vmem_limit_bytes=vmem_limit),
  )(Q.astype(bf16), K.astype(bf16), V.astype(bf16),
    wqp, bqp, wkp, bkp, wq_s, wk_s, wv_s, wo_s)


# ---------------------------------------------------------------------------
# Parameter init + pure-JAX reference
# ---------------------------------------------------------------------------

def init_params(key, dim_q, dim_k, dim_v, n_layers):
  def uniform(k, shape, fan_in):
    bound = 1.0 / math.sqrt(fan_in)
    return jax.random.uniform(k, shape, jnp.float32, -bound, bound)

  keys = jax.random.split(key, 4 + 4 * n_layers)
  params = {
      "wq_proj": uniform(keys[0], (dim_v, dim_q), dim_q),
      "bq_proj": uniform(keys[1], (dim_v,), dim_q),
      "wk_proj": uniform(keys[2], (dim_v, dim_k), dim_k),
      "bk_proj": uniform(keys[3], (dim_v,), dim_k),
      "layers": [],
  }
  for l in range(n_layers):
    kq, kk, kv, ko = keys[4 + 4 * l: 8 + 4 * l]
    params["layers"].append({
        "wq": uniform(kq, (dim_v, dim_v), dim_v),
        "wk": uniform(kk, (dim_v, dim_v), dim_v),
        "wv": uniform(kv, (dim_v, dim_v), dim_v),
        "wo": uniform(ko, (dim_v, dim_v), dim_v),
    })
  return params


def reference_forward(params, Q, K, V, num_heads):
  """Pure-JAX f32 reference mirroring the PyTorch forward (eval, no masks)."""
  def lin(x, w, b=None):
    y = jnp.einsum("bnd,od->bno", x, w)
    return y if b is None else y + b

  Qp = lin(Q, params["wq_proj"], params["bq_proj"])
  Kp = lin(K, params["wk_proj"], params["bk_proj"])
  for layer in params["layers"]:
    D = Qp.shape[-1]
    ds = D // num_heads
    q = lin(Qp, layer["wq"])
    k = lin(Kp, layer["wk"])
    v = lin(V, layer["wv"])
    qh = q.reshape(q.shape[0], q.shape[1], num_heads, ds)
    kh = k.reshape(k.shape[0], k.shape[1], num_heads, ds)
    vh = v.reshape(v.shape[0], v.shape[1], num_heads, ds)
    s = jnp.einsum("bqhd,bkhd->bhqk", qh, kh) / math.sqrt(D)
    a = jax.nn.softmax(s, axis=-1)
    o = jnp.einsum("bhqk,bkhd->bqhd", a, vh).reshape(q.shape)
    o = q + o
    o = o + jax.nn.relu(lin(o, layer["wo"]))
    Qp = o
  return Qp


if __name__ == "__main__":
  B, Nq, Nk = 2, 8, 8
  dim_q, dim_k, dim_v = 16, 24, 32
  n_layers, n_heads = 2, 4

  key = jax.random.PRNGKey(0)
  k_param, k_q, k_k, k_v = jax.random.split(key, 4)

  params = init_params(k_param, dim_q, dim_k, dim_v, n_layers)
  Q = jax.random.normal(k_q, (B, Nq, dim_q), jnp.float32)
  K = jax.random.normal(k_k, (B, Nk, dim_k), jnp.float32)
  V = jax.random.normal(k_v, (B, Nk, dim_v), jnp.float32)

  out = cross_attention_forward(params, Q, K, V, n_heads)
  out = jax.block_until_ready(out)

  ref = reference_forward(params, Q, K, V, n_heads)
  assert out.shape == (B, Nq, dim_v), out.shape
  err = float(jnp.max(jnp.abs(out - ref)))
  # bf16 matmul operands (f32 accumulation, f32 softmax) + approx reciprocal
  # -> relaxed tolerance against the all-f32 reference.
  assert jnp.allclose(out, ref, rtol=5e-2, atol=5e-2), err

  print("KERNEL_OK")
</pallas_src>

<mosaic_0001>
module attributes {stable_mosaic.version = 11 : i64} {
  func.func @_cross_attention_kernel(%arg0: i32, %arg1: i32, %arg2: i32, %arg3: memref<1x8x16xbf16, #tpu.memory_space<vmem>>, %arg4: memref<1x8x24xbf16, #tpu.memory_space<vmem>>, %arg5: memref<1x8x32xbf16, #tpu.memory_space<vmem>>, %arg6: memref<32x16xbf16, #tpu.memory_space<vmem>>, %arg7: memref<1x32xf32, #tpu.memory_space<vmem>>, %arg8: memref<32x24xbf16, #tpu.memory_space<vmem>>, %arg9: memref<1x32xf32, #tpu.memory_space<vmem>>, %arg10: memref<1x32x32xbf16, #tpu.memory_space<vmem>>, %arg11: memref<1x32x32xbf16, #tpu.memory_space<vmem>>, %arg12: memref<1x32x32xbf16, #tpu.memory_space<vmem>>, %arg13: memref<1x32x32xbf16, #tpu.memory_space<vmem>>, %arg14: memref<1x8x32xf32, #tpu.memory_space<vmem>>, %arg15: memref<8x32xf32, #tpu.memory_space<vmem>>, %arg16: memref<8x32xbf16, #tpu.memory_space<vmem>>, %arg17: memref<4x8x8xbf16, #tpu.memory_space<vmem>>, %arg18: memref<4x8x8xbf16, #tpu.memory_space<vmem>>) attributes {dimension_semantics = [#tpu.dimension_semantics<parallel>, #tpu.dimension_semantics<arbitrary>, #tpu.dimension_semantics<arbitrary>], iteration_bounds = array<i64: 2, 2, 1>, scalar_prefetch = 0 : i64, scratch_operands = 4 : i64, tpu.core_type = #tpu.core_type<tc>, window_params = [{transform_indices = @transform_0, window_bounds = array<i64: 1, 8, 16>}, {transform_indices = @transform_1, window_bounds = array<i64: 1, 8, 24>}, {transform_indices = @transform_2, window_bounds = array<i64: 1, 8, 32>}, {pipeline_mode = #tpu.pipeline_mode<synchronous>, transform_indices = @transform_3, window_bounds = array<i64: 32, 16>}, {pipeline_mode = #tpu.pipeline_mode<synchronous>, transform_indices = @transform_4, window_bounds = array<i64: 1, 32>}, {pipeline_mode = #tpu.pipeline_mode<synchronous>, transform_indices = @transform_5, window_bounds = array<i64: 32, 24>}, {pipeline_mode = #tpu.pipeline_mode<synchronous>, transform_indices = @transform_6, window_bounds = array<i64: 1, 32>}, {transform_indices = @transform_7, window_bounds = array<i64: 1, 32, 32>}, {transform_indices = @transform_8, window_bounds = array<i64: 1, 32, 32>}, {transform_indices = @transform_9, window_bounds = array<i64: 1, 32, 32>}, {transform_indices = @transform_10, window_bounds = array<i64: 1, 32, 32>}, {transform_indices = @transform_11, window_bounds = array<i64: 1, 8, 32>}]} {
    %c0_i32 = arith.constant 0 : i32
    %0 = arith.cmpi eq, %arg1, %c0_i32 : i32
    %c0_i32_0 = arith.constant 0 : i32
    %1 = arith.cmpi eq, %arg2, %c0_i32_0 : i32
    %2 = arith.andi %0, %1 : i1
    %3 = arith.extui %2 : i1 to i32
    %c0_i32_1 = arith.constant 0 : i32
    %4 = arith.cmpi ne, %3, %c0_i32_1 : i32
    scf.if %4 {
      %c0_26 = arith.constant 0 : index
      %c0_27 = arith.constant 0 : index
      %c0_28 = arith.constant 0 : index
      %66 = vector.load %arg4[%c0_26, %c0_27, %c0_28] : memref<1x8x24xbf16, #tpu.memory_space<vmem>>, vector<1x8x24xbf16>
      %67 = vector.shape_cast %66 : vector<1x8x24xbf16> to vector<8x24xbf16>
      %c0_29 = arith.constant 0 : index
      %c0_30 = arith.constant 0 : index
      %68 = vector.load %arg8[%c0_29, %c0_30] : memref<32x24xbf16, #tpu.memory_space<vmem>>, vector<32x24xbf16>
      %cst_31 = arith.constant dense<0.000000e+00> : vector<8x32xf32>
      %69 = tpu.matmul %67, %68, %cst_31 {dimension_numbers = #tpu.dot_dimension_numbers<[1], [1], [0], [0], [0, 0, 1, 0], [], []>} : vector<8x24xbf16>, vector<32x24xbf16>, vector<8x32xf32> -> vector<8x32xf32>
      %c0_32 = arith.constant 0 : index
      %c0_33 = arith.constant 0 : index
      %70 = vector.load %arg9[%c0_32, %c0_33] : memref<1x32xf32, #tpu.memory_space<vmem>>, vector<1x32xf32>
      %71 = vector.broadcast %70 : vector<1x32xf32> to vector<8x32xf32>
      %72 = arith.addf %69, %71 : vector<8x32xf32>
      %73 = arith.truncf %72 : vector<8x32xf32> to vector<8x32xbf16>
      %c0_34 = arith.constant 0 : index
      %c0_35 = arith.constant 0 : index
      %74 = vector.load %arg16[%c0_34, %c0_35] : memref<8x32xbf16, #tpu.memory_space<vmem>>, vector<8x32xbf16>
      tpu.vector_store %arg16[%c0_34, %c0_35], %73 {strides = array<i32>} : memref<8x32xbf16, #tpu.memory_space<vmem>>, vector<8x32xbf16>,
    } else {
    }
    %c0_i32_2 = arith.constant 0 : i32
    %5 = arith.cmpi eq, %arg2, %c0_i32_2 : i32
    %6 = arith.extui %5 : i1 to i32
    %c0_i32_3 = arith.constant 0 : i32
    %7 = arith.cmpi ne, %6, %c0_i32_3 : i32
    scf.if %7 {
      %c0_26 = arith.constant 0 : index
      %c0_27 = arith.constant 0 : index
      %66 = vector.load %arg16[%c0_26, %c0_27] : memref<8x32xbf16, #tpu.memory_space<vmem>>, vector<8x32xbf16>
      %c0_28 = arith.constant 0 : index
      %c0_29 = arith.constant 0 : index
      %c0_30 = arith.constant 0 : index
      %67 = vector.load %arg11[%c0_28, %c0_29, %c0_30] : memref<1x32x32xbf16, #tpu.memory_space<vmem>>, vector<1x32x32xbf16>
      %68 = vector.shape_cast %67 : vector<1x32x32xbf16> to vector<32x32xbf16>
      %cst_31 = arith.constant dense<0.000000e+00> : vector<8x32xf32>
      %69 = tpu.matmul %66, %68, %cst_31 {dimension_numbers = #tpu.dot_dimension_numbers<[1], [1], [0], [0], [0, 0, 1, 0], [], []>} : vector<8x32xbf16>, vector<32x32xbf16>, vector<8x32xf32> -> vector<8x32xf32>
      %70 = vector.extract_strided_slice %69 {offsets = [0, 0], sizes = [8, 8], strides = [1, 1]} : vector<8x32xf32> to vector<8x8xf32>
      %71 = vector.extract_strided_slice %69 {offsets = [0, 8], sizes = [8, 8], strides = [1, 1]} : vector<8x32xf32> to vector<8x8xf32>
      %72 = vector.extract_strided_slice %69 {offsets = [0, 16], sizes = [8, 8], strides = [1, 1]} : vector<8x32xf32> to vector<8x8xf32>
      %73 = vector.extract_strided_slice %69 {offsets = [0, 24], sizes = [8, 8], strides = [1, 1]} : vector<8x32xf32> to vector<8x8xf32>
      %74 = vector.shape_cast %70 : vector<8x8xf32> to vector<1x8x8xf32>
      %75 = vector.shape_cast %71 : vector<8x8xf32> to vector<1x8x8xf32>
      %76 = vector.shape_cast %72 : vector<8x8xf32> to vector<1x8x8xf32>
      %77 = vector.shape_cast %73 : vector<8x8xf32> to vector<1x8x8xf32>
      %78 = tpu.concatenate %74, %75, %76, %77 in 0 : vector<1x8x8xf32>, vector<1x8x8xf32>, vector<1x8x8xf32>, vector<1x8x8xf32> -> vector<4x8x8xf32>
      %79 = arith.truncf %78 : vector<4x8x8xf32> to vector<4x8x8xbf16>
      %c0_32 = arith.constant 0 : index
      %c0_33 = arith.constant 0 : index
      %c0_34 = arith.constant 0 : index
      %80 = vector.load %arg17[%c0_32, %c0_33, %c0_34] : memref<4x8x8xbf16, #tpu.memory_space<vmem>>, vector<4x8x8xbf16>
      tpu.vector_store %arg17[%c0_32, %c0_33, %c0_34], %79 {strides = array<i32>} : memref<4x8x8xbf16, #tpu.memory_space<vmem>>, vector<4x8x8xbf16>,
      %c0_35 = arith.constant 0 : index
      %c0_36 = arith.constant 0 : index
      %c0_37 = arith.constant 0 : index
      %81 = vector.load %arg5[%c0_35, %c0_36, %c0_37] : memref<1x8x32xbf16, #tpu.memory_space<vmem>>, vector<1x8x32xbf16>
      %82 = vector.shape_cast %81 : vector<1x8x32xbf16> to vector<8x32xbf16>
      %c0_38 = arith.constant 0 : index
      %c0_39 = arith.constant 0 : index
      %c0_40 = arith.constant 0 : index
      %83 = vector.load %arg12[%c0_38, %c0_39, %c0_40] : memref<1x32x32xbf16, #tpu.memory_space<vmem>>, vector<1x32x32xbf16>
      %84 = vector.shape_cast %83 : vector<1x32x32xbf16> to vector<32x32xbf16>
      %cst_41 = arith.constant dense<0.000000e+00> : vector<8x32xf32>
      %85 = tpu.matmul %82, %84, %cst_41 {dimension_numbers = #tpu.dot_dimension_numbers<[1], [1], [0], [0], [0, 0, 1, 0], [], []>} : vector<8x32xbf16>, vector<32x32xbf16>, vector<8x32xf32> -> vector<8x32xf32>
      %86 = vector.extract_strided_slice %85 {offsets = [0, 0], sizes = [8, 8], strides = [1, 1]} : vector<8x32xf32> to vector<8x8xf32>
      %87 = vector.extract_strided_slice %85 {offsets = [0, 8], sizes = [8, 8], strides = [1, 1]} : vector<8x32xf32> to vector<8x8xf32>
      %88 = vector.extract_strided_slice %85 {offsets = [0, 16], sizes = [8, 8], strides = [1, 1]} : vector<8x32xf32> to vector<8x8xf32>
      %89 = vector.extract_strided_slice %85 {offsets = [0, 24], sizes = [8, 8], strides = [1, 1]} : vector<8x32xf32> to vector<8x8xf32>
      %90 = vector.shape_cast %86 : vector<8x8xf32> to vector<1x8x8xf32>
      %91 = vector.shape_cast %87 : vector<8x8xf32> to vector<1x8x8xf32>
      %92 = vector.shape_cast %88 : vector<8x8xf32> to vector<1x8x8xf32>
      %93 = vector.shape_cast %89 : vector<8x8xf32> to vector<1x8x8xf32>
      %94 = tpu.concatenate %90, %91, %92, %93 in 0 : vector<1x8x8xf32>, vector<1x8x8xf32>, vector<1x8x8xf32>, vector<1x8x8xf32> -> vector<4x8x8xf32>
      %95 = arith.truncf %94 : vector<4x8x8xf32> to vector<4x8x8xbf16>
      %c0_42 = arith.constant 0 : index
      %c0_43 = arith.constant 0 : index
      %c0_44 = arith.constant 0 : index
      %96 = vector.load %arg18[%c0_42, %c0_43, %c0_44] : memref<4x8x8xbf16, #tpu.memory_space<vmem>>, vector<4x8x8xbf16>
      tpu.vector_store %arg18[%c0_42, %c0_43, %c0_44], %95 {strides = array<i32>} : memref<4x8x8xbf16, #tpu.memory_space<vmem>>, vector<4x8x8xbf16>,
    } else {
    }
    %c8_i32 = arith.constant 8 : i32
    %8 = arith.muli %arg2, %c8_i32 : i32
    %9 = tpu.assume_multiple %8, 8 : i32
    %c0_i32_4 = arith.constant 0 : i32
    %10 = arith.cmpi eq, %arg1, %c0_i32_4 : i32
    %11 = arith.extui %10 : i1 to i32
    %c0_i32_5 = arith.constant 0 : i32
    %12 = arith.cmpi ne, %11, %c0_i32_5 : i32
    scf.if %12 {
      %c0_26 = arith.constant 0 : index
      %c0_27 = arith.constant 0 : index
      %c0_28 = arith.constant 0 : index
      %66 = vector.load %arg3[%c0_26, %c0_27, %c0_28] : memref<1x8x16xbf16, #tpu.memory_space<vmem>>, vector<1x8x16xbf16>
      %67 = vector.shape_cast %66 : vector<1x8x16xbf16> to vector<8x16xbf16>
      %c0_29 = arith.constant 0 : index
      %c0_30 = arith.constant 0 : index
      %68 = vector.load %arg6[%c0_29, %c0_30] : memref<32x16xbf16, #tpu.memory_space<vmem>>, vector<32x16xbf16>
      %cst_31 = arith.constant dense<0.000000e+00> : vector<8x32xf32>
      %69 = tpu.matmul %67, %68, %cst_31 {dimension_numbers = #tpu.dot_dimension_numbers<[1], [1], [0], [0], [0, 0, 1, 0], [], []>} : vector<8x16xbf16>, vector<32x16xbf16>, vector<8x32xf32> -> vector<8x32xf32>
      %c0_32 = arith.constant 0 : index
      %c0_33 = arith.constant 0 : index
      %70 = vector.load %arg7[%c0_32, %c0_33] : memref<1x32xf32, #tpu.memory_space<vmem>>, vector<1x32xf32>
      %71 = vector.broadcast %70 : vector<1x32xf32> to vector<8x32xf32>
      %72 = arith.addf %69, %71 : vector<8x32xf32>
      %73 = arith.index_cast %9 : i32 to index
      %c0_34 = arith.constant 0 : index
      %74 = vector.load %arg15[%73, %c0_34] : memref<8x32xf32, #tpu.memory_space<vmem>>, vector<8x32xf32>
      tpu.vector_store %arg15[%73, %c0_34], %72 {strides = array<i32>} : memref<8x32xf32, #tpu.memory_space<vmem>>, vector<8x32xf32>,
    } else {
    }
    %13 = arith.index_cast %9 : i32 to index
    %c0 = arith.constant 0 : index
    %14 = vector.load %arg15[%13, %c0] : memref<8x32xf32, #tpu.memory_space<vmem>>, vector<8x32xf32>
    %15 = arith.truncf %14 : vector<8x32xf32> to vector<8x32xbf16>
    %c0_6 = arith.constant 0 : index
    %c0_7 = arith.constant 0 : index
    %c0_8 = arith.constant 0 : index
    %16 = vector.load %arg10[%c0_6, %c0_7, %c0_8] : memref<1x32x32xbf16, #tpu.memory_space<vmem>>, vector<1x32x32xbf16>
    %17 = vector.shape_cast %16 : vector<1x32x32xbf16> to vector<32x32xbf16>
    %cst = arith.constant dense<0.000000e+00> : vector<8x32xf32>
    %18 = tpu.matmul %15, %17, %cst {dimension_numbers = #tpu.dot_dimension_numbers<[1], [1], [0], [0], [0, 0, 1, 0], [], []>} : vector<8x32xbf16>, vector<32x32xbf16>, vector<8x32xf32> -> vector<8x32xf32>
    %19 = vector.extract_strided_slice %18 {offsets = [0, 0], sizes = [8, 8], strides = [1, 1]} : vector<8x32xf32> to vector<8x8xf32>
    %20 = vector.extract_strided_slice %18 {offsets = [0, 8], sizes = [8, 8], strides = [1, 1]} : vector<8x32xf32> to vector<8x8xf32>
    %21 = vector.extract_strided_slice %18 {offsets = [0, 16], sizes = [8, 8], strides = [1, 1]} : vector<8x32xf32> to vector<8x8xf32>
    %22 = vector.extract_strided_slice %18 {offsets = [0, 24], sizes = [8, 8], strides = [1, 1]} : vector<8x32xf32> to vector<8x8xf32>
    %23 = vector.shape_cast %19 : vector<8x8xf32> to vector<1x8x8xf32>
    %24 = vector.shape_cast %20 : vector<8x8xf32> to vector<1x8x8xf32>
    %25 = vector.shape_cast %21 : vector<8x8xf32> to vector<1x8x8xf32>
    %26 = vector.shape_cast %22 : vector<8x8xf32> to vector<1x8x8xf32>
    %27 = tpu.concatenate %23, %24, %25, %26 in 0 : vector<1x8x8xf32>, vector<1x8x8xf32>, vector<1x8x8xf32>, vector<1x8x8xf32> -> vector<4x8x8xf32>
    %28 = arith.truncf %27 : vector<4x8x8xf32> to vector<4x8x8xbf16>
    %c0_9 = arith.constant 0 : index
    %c0_10 = arith.constant 0 : index
    %c0_11 = arith.constant 0 : index
    %29 = vector.load %arg17[%c0_9, %c0_10, %c0_11] : memref<4x8x8xbf16, #tpu.memory_space<vmem>>, vector<4x8x8xbf16>
    "tpu.trace_start"() <{level = 10 : i32, message = "hqe,hke->hqk"}> : () -> ()
    %cst_12 = arith.constant dense<0.000000e+00> : vector<4x8x8xf32>
    %30 = tpu.matmul %28, %29, %cst_12 {dimension_numbers = #tpu.dot_dimension_numbers<[2], [2], [1], [1], [0, 0, 0, 1, 1, 1], [0], [0]>} : vector<4x8x8xbf16>, vector<4x8x8xbf16>, vector<4x8x8xf32> -> vector<4x8x8xf32>
    "tpu.trace_stop"() : () -> ()
    %cst_13 = arith.constant dense<0xFF800000> : vector<4x8xf32>
    %31 = vector.multi_reduction <maximumf>, %30, %cst_13 [2] : vector<4x8x8xf32> to vector<4x8xf32>
    %32 = vector.shape_cast %31 : vector<4x8xf32> to vector<4x8x1xf32>
    %33 = vector.broadcast %32 : vector<4x8x1xf32> to vector<4x8x8xf32>
    %34 = arith.subf %30, %33 : vector<4x8x8xf32>
    %35 = math.exp %34 : vector<4x8x8xf32>
    %cst_14 = arith.constant dense<0.000000e+00> : vector<4x8xf32>
    %36 = vector.multi_reduction <add>, %35, %cst_14 [2] : vector<4x8x8xf32> to vector<4x8xf32>
    %37 = vector.shape_cast %36 : vector<4x8xf32> to vector<4x8x1xf32>
    %38 = tpu.reciprocal %37 {approx = true} : vector<4x8x1xf32> -> vector<4x8x1xf32>
    %39 = vector.broadcast %38 : vector<4x8x1xf32> to vector<4x8x8xf32>
    %40 = arith.mulf %35, %39 : vector<4x8x8xf32>
    %41 = arith.truncf %40 : vector<4x8x8xf32> to vector<4x8x8xbf16>
    %c0_15 = arith.constant 0 : index
    %c0_16 = arith.constant 0 : index
    %c0_17 = arith.constant 0 : index
    %42 = vector.load %arg18[%c0_15, %c0_16, %c0_17] : memref<4x8x8xbf16, #tpu.memory_space<vmem>>, vector<4x8x8xbf16>
    "tpu.trace_start"() <{level = 10 : i32, message = "hqk,hke->hqe"}> : () -> ()
    %cst_18 = arith.constant dense<0.000000e+00> : vector<4x8x8xf32>
    %43 = tpu.matmul %41, %42, %cst_18 {dimension_numbers = #tpu.dot_dimension_numbers<[2], [1], [1], [2], [0, 0, 0, 1, 1, 2], [0], [0]>} : vector<4x8x8xbf16>, vector<4x8x8xbf16>, vector<4x8x8xf32> -> vector<4x8x8xf32>
    "tpu.trace_stop"() : () -> ()
    %44 = vector.extract_strided_slice %43 {offsets = [0, 0, 0], sizes = [1, 8, 8], strides = [1, 1, 1]} : vector<4x8x8xf32> to vector<1x8x8xf32>
    %45 = vector.shape_cast %44 : vector<1x8x8xf32> to vector<8x8xf32>
    %46 = vector.extract_strided_slice %43 {offsets = [1, 0, 0], sizes = [1, 8, 8], strides = [1, 1, 1]} : vector<4x8x8xf32> to vector<1x8x8xf32>
    %47 = vector.shape_cast %46 : vector<1x8x8xf32> to vector<8x8xf32>
    %48 = vector.extract_strided_slice %43 {offsets = [2, 0, 0], sizes = [1, 8, 8], strides = [1, 1, 1]} : vector<4x8x8xf32> to vector<1x8x8xf32>
    %49 = vector.shape_cast %48 : vector<1x8x8xf32> to vector<8x8xf32>
    %50 = vector.extract_strided_slice %43 {offsets = [3, 0, 0], sizes = [1, 8, 8], strides = [1, 1, 1]} : vector<4x8x8xf32> to vector<1x8x8xf32>
    %51 = vector.shape_cast %50 : vector<1x8x8xf32> to vector<8x8xf32>
    %52 = tpu.concatenate %45, %47, %49, %51 in 1 : vector<8x8xf32>, vector<8x8xf32>, vector<8x8xf32>, vector<8x8xf32> -> vector<8x32xf32>
    %53 = arith.addf %18, %52 : vector<8x32xf32>
    %54 = arith.truncf %53 : vector<8x32xf32> to vector<8x32xbf16>
    %c0_19 = arith.constant 0 : index
    %c0_20 = arith.constant 0 : index
    %c0_21 = arith.constant 0 : index
    %55 = vector.load %arg13[%c0_19, %c0_20, %c0_21] : memref<1x32x32xbf16, #tpu.memory_space<vmem>>, vector<1x32x32xbf16>
    %56 = vector.shape_cast %55 : vector<1x32x32xbf16> to vector<32x32xbf16>
    %cst_22 = arith.constant dense<0.000000e+00> : vector<8x32xf32>
    %57 = tpu.matmul %54, %56, %cst_22 {dimension_numbers = #tpu.dot_dimension_numbers<[1], [1], [0], [0], [0, 0, 1, 0], [], []>} : vector<8x32xbf16>, vector<32x32xbf16>, vector<8x32xf32> -> vector<8x32xf32>
    %cst_23 = arith.constant 0.000000e+00 : f32
    %58 = vector.broadcast %cst_23 : f32 to vector<8x32xf32>
    %59 = arith.maximumf %57, %58 : vector<8x32xf32>
    %60 = arith.addf %53, %59 : vector<8x32xf32>
    %61 = arith.index_cast %9 : i32 to index
    %c0_24 = arith.constant 0 : index
    %62 = vector.load %arg15[%61, %c0_24] : memref<8x32xf32, #tpu.memory_space<vmem>>, vector<8x32xf32>
    tpu.vector_store %arg15[%61, %c0_24], %60 {strides = array<i32>} : memref<8x32xf32, #tpu.memory_space<vmem>>, vector<8x32xf32>,
    %c1_i32 = arith.constant 1 : i32
    %63 = arith.cmpi eq, %arg1, %c1_i32 : i32
    %64 = arith.extui %63 : i1 to i32
    %c0_i32_25 = arith.constant 0 : i32
    %65 = arith.cmpi ne, %64, %c0_i32_25 : i32
    scf.if %65 {
      %c0_26 = arith.constant 0 : index
      %c0_27 = arith.constant 0 : index
      %c0_28 = arith.constant 0 : index
      %66 = vector.load %arg14[%c0_26, %c0_27, %c0_28] : memref<1x8x32xf32, #tpu.memory_space<vmem>>, vector<1x8x32xf32>
      %67 = vector.shape_cast %66 : vector<1x8x32xf32> to vector<8x32xf32>
      %68 = vector.shape_cast %60 : vector<8x32xf32> to vector<1x8x32xf32>
      tpu.vector_store %arg14[%c0_26, %c0_27, %c0_28], %68 {strides = array<i32>} : memref<1x8x32xf32, #tpu.memory_space<vmem>>, vector<1x8x32xf32>,
    } else {
    }
    return
  }
  func.func @transform_0(%arg0: i32, %arg1: i32, %arg2: i32) -> (i32, i32, i32) {
    %c0_i32 = arith.constant 0 : i32
    %c0_i32_0 = arith.constant 0 : i32
    return %arg0, %arg2, %c0_i32 : i32, i32, i32
  }
  func.func @transform_1(%arg0: i32, %arg1: i32, %arg2: i32) -> (i32, i32, i32) {
    %c0_i32 = arith.constant 0 : i32
    %c0_i32_0 = arith.constant 0 : i32
    %c0_i32_1 = arith.constant 0 : i32
    return %arg0, %c0_i32, %c0_i32_0 : i32, i32, i32
  }
  func.func @transform_2(%arg0: i32, %arg1: i32, %arg2: i32) -> (i32, i32, i32) {
    %c0_i32 = arith.constant 0 : i32
    %c0_i32_0 = arith.constant 0 : i32
    %c0_i32_1 = arith.constant 0 : i32
    return %arg0, %c0_i32, %c0_i32_0 : i32, i32, i32
  }
  func.func @transform_3(%arg0: i32, %arg1: i32, %arg2: i32) -> (i32, i32) {
    %c0_i32 = arith.constant 0 : i32
    %c0_i32_0 = arith.constant 0 : i32
    %c0_i32_1 = arith.constant 0 : i32
    return %c0_i32, %c0_i32_0 : i32, i32
  }
  func.func @transform_4(%arg0: i32, %arg1: i32, %arg2: i32) -> (i32, i32) {
    %c0_i32 = arith.constant 0 : i32
    %c0_i32_0 = arith.constant 0 : i32
    %c0_i32_1 = arith.constant 0 : i32
    return %c0_i32, %c0_i32_0 : i32, i32
  }
  func.func @transform_5(%arg0: i32, %arg1: i32, %arg2: i32) -> (i32, i32) {
    %c0_i32 = arith.constant 0 : i32
    %c0_i32_0 = arith.constant 0 : i32
    %c0_i32_1 = arith.constant 0 : i32
    return %c0_i32, %c0_i32_0 : i32, i32
  }
  func.func @transform_6(%arg0: i32, %arg1: i32, %arg2: i32) -> (i32, i32) {
    %c0_i32 = arith.constant 0 : i32
    %c0_i32_0 = arith.constant 0 : i32
    %c0_i32_1 = arith.constant 0 : i32
    return %c0_i32, %c0_i32_0 : i32, i32
  }
  func.func @transform_7(%arg0: i32, %arg1: i32, %arg2: i32) -> (i32, i32, i32) {
    %c0_i32 = arith.constant 0 : i32
    %c0_i32_0 = arith.constant 0 : i32
    %c0_i32_1 = arith.constant 0 : i32
    return %arg1, %c0_i32, %c0_i32_0 : i32, i32, i32
  }
  func.func @transform_8(%arg0: i32, %arg1: i32, %arg2: i32) -> (i32, i32, i32) {
    %c0_i32 = arith.constant 0 : i32
    %c0_i32_0 = arith.constant 0 : i32
    %c0_i32_1 = arith.constant 0 : i32
    return %arg1, %c0_i32, %c0_i32_0 : i32, i32, i32
  }
  func.func @transform_9(%arg0: i32, %arg1: i32, %arg2: i32) -> (i32, i32, i32) {
    %c0_i32 = arith.constant 0 : i32
    %c0_i32_0 = arith.constant 0 : i32
    %c0_i32_1 = arith.constant 0 : i32
    return %arg1, %c0_i32, %c0_i32_0 : i32, i32, i32
  }
  func.func @transform_10(%arg0: i32, %arg1: i32, %arg2: i32) -> (i32, i32, i32) {
    %c0_i32 = arith.constant 0 : i32
    %c0_i32_0 = arith.constant 0 : i32
    %c0_i32_1 = arith.constant 0 : i32
    return %arg1, %c0_i32, %c0_i32_0 : i32, i32, i32
  }
  func.func @transform_11(%arg0: i32, %arg1: i32, %arg2: i32) -> (i32, i32, i32) {
    %c0_i32 = arith.constant 0 : i32
    %c0_i32_0 = arith.constant 0 : i32
    return %arg0, %arg2, %c0_i32 : i32, i32, i32
  }
}

</mosaic_0001>

<bundles_post_ra>
// kernel: tpu_custom_call.1
= control target key start
LH: loop header
LB: loop body
LE: loop exit
PB: predicated region body
PF: predicated region fallthrough
CT: control target
= control target key end

     0   :  { %s3113_s0 = inlined_call_operand.hbm [shape: bf16[2,8,16], index: 0, kind: input, shape index: {}]   ;;  %s3114_s1 = inlined_call_operand.hbm [shape: bf16[2,8,24], index: 1, kind: input, shape index: {}]   ;;  %s3115_s2 = inlined_call_operand.hbm [shape: bf16[2,8,32], index: 2, kind: input, shape index: {}]   ;;  %s3116_s3 = inlined_call_operand.vmem [shape: bf16[32,16], index: 3, kind: input, shape index: {}]   ;;  %s3117_s4 = inlined_call_operand.hbm [shape: f32[1,32], index: 4, kind: input, shape index: {}]   ;;  %s3118_s5 = inlined_call_operand.vmem [shape: bf16[32,24], index: 5, kind: input, shape index: {}]   ;;  %s3119_s6 = inlined_call_operand.hbm [shape: f32[1,32], index: 6, kind: input, shape index: {}]   ;;  %s3120_s7 = inlined_call_operand.vmem [shape: bf16[2,32,32], index: 7, kind: input, shape index: {}]   ;;  %s3121_s8 = inlined_call_operand.vmem [shape: bf16[2,32,32], index: 8, kind: input, shape index: {}]   ;;  %s3122_s9 = inlined_call_operand.hbm [shape: bf16[2,32,32], index: 9, kind: input, shape index: {}]   ;;  %s3123_s10 = inlined_call_operand.hbm [shape: bf16[2,32,32], index: 10, kind: input, shape index: {}]   ;;  %s3124_s11 = inlined_call_operand.hbm [shape: f32[2,8,32], index: 11, kind: output, shape index: {}]  }
   0x1   :  { %3155 = sst [smem:[#allocation38_spill]] %s3114_s1 }
   0x2   :  { %3156 = sst [smem:[#allocation39_spill]] %s3116_s3 }
   0x3   :  { %3157 = sst [smem:[#allocation40_spill]] %s3117_s4 }
   0x4   :  { %3158 = sst [smem:[#allocation41_spill]] %s3118_s5 }
   0x5   :  { %3159 = sst [smem:[#allocation42_spill]] %s3120_s7 }
   0x6   :  { %3160 = sst [smem:[#allocation43_spill]] %s3121_s8 }
   0x7   :  { %3161 = sst [smem:[#allocation44_spill]] %s3122_s9 }
   0x8   :  { %3162 = sst [smem:[#allocation45_spill]] %s3124_s11 }
   0x9   :  { %16 = vsyncpa [#allocation7], 0 }
   0xa   :  { %18 = vsyncpa [#allocation7 + $0x1], 0 }
   0xb   :  { %19 = vsyncpa [#allocation10], 0 }
   0xc   :  { %21 = vsyncpa [#allocation10 + $0x1], 0 }
   0xd   :  { %22 = vsyncpa [#allocation13], 0 }
   0xe   :  { %23 = vsyncpa [#allocation16], 0 }
   0xf   :  { %25 = vsyncpa [#allocation16 + $0x1], 0 }
  0x10   :  { %26 = vsyncpa [#allocation8], 0 }
  0x11   :  { %28 = vsyncpa [#allocation8 + $0x1], 0  ;;  %s2609_s17 = smov 0   ;;  %s2611_s18 = smov 0  }
  0x12   :  { %s2613_s19 = smov 0   ;;  %s2615_s20 = smov 0  }
  0x13   :  { %3163 = sst [smem:[#allocation24_spill]] %s2615_s20  ;;  %s2617_s21 = smov 0  }
  0x14   :  { %s2619_s22 = smov 0   ;;  %s2621_s23 = smov 0  }
  0x15   :  { %s2623_s24 = smov 0   ;;  %s2625_s25 = smov 0  }
  0x16   :  { %s2627_s26 = smov 0   ;;  %s2629_s27 = smov 0  }
  0x17 LB: > { %s3165_s20 = sld [smem:[#allocation24_spill]]  ;;  %s2663_s28 = sadd.s32 4294967295, %s2525_s27   ;;  %s2525_s27 = sphi %s2629_s27, %s34_s27   ;;  %s2521_s26 = sphi %s2627_s26, %s3235_s26   ;;  %s2517_s25 = sphi %s2625_s25, %s3242_s25   ;;  %s2513_s24 = sphi %s2623_s24, %s3233_s24   ;;  %s2509_s23 = sphi %s2621_s23, %s3241_s23   ;;  %s2505_s22 = sphi %s2619_s22, %s3240_s22   ;;  %s2501_s21 = sphi %s2617_s21, %s3239_s21   ;;  %s2493_s19 = sphi %s2613_s19, %s3237_s19   ;;  %s2489_s18 = sphi %s2611_s18, %s3236_s18   ;;  %s2485_s17 = sphi %s2609_s17, %s3230_s17  }
  0x18   : > { %3166 = sst [smem:[#allocation24_spill]] %s2489_s18  ;;  %p289_p0 = scmp.ne.s32.totalorder %s2489_s18, %s2485_s17 }
  0x19   : > { %3168 = sst [smem:[#allocation26_spill]] %s2501_s21  ;;  %p3140_p1 = scmp.eq.s32.totalorder %s2663_s28, 0 }
  0x1a   : > { %3169 = sst [smem:[#allocation27_spill]] %s2509_s23  ;;  %p341_p2 = scmp.eq.s32.totalorder %s2663_s28, 3 }
  0x1b   : > { %3170 = sst [smem:[#allocation28_spill]] %s2513_s24  ;;  %p1802_p3 = scmp.ge.s32.totalorder %s2525_s27, 1 }
  0x1c   : > { %3171 = sst [smem:[#allocation29_spill]] %s2521_s26  ;;  %p354_p4 = scmp.lt.s32.totalorder %s2525_s27, 5 }
  0x1d   : > { %3167 = sst [smem:[#allocation25_spill]] %s3165_s20  ;;  %p2672_p5 = por %p289_p0, %p3140_p1 }
  0x1e   : > { %3172 = sst [smem:[#allocation30_spill]] %s2663_s28  ;;  %p2676_p6 = pnand %p1802_p3, %p354_p4 }
  0x1f   : > { %s3173_s29 = scalar_select %p2672_p5, 1, 0 }
  0x20   : > { %s3175_s30 = scalar_select %p2676_p6, 1, 0 }
  0x21   : > { %3174 = sst [smem:[#allocation31_spill]] %s3173_s29  ;;  %s2527_s12 = smov [#allocation12]  }
  0x22   : > { %3176 = sst [smem:[#allocation32_spill]] %s3175_s30  ;;  %s370_s13 = sshll.u32 %s2527_s12, 4  ;;  %s371_s13 = int_to_ptr.vmem [resolvable:$true] %s370_s13 }
  0x23   : > { %p2021_p7 = pneg %p2676_p6  ;;  %s2212_s15 = scalar_lea.vmem %s371_s13, 16 }
  0x24   : > { %p2213_p10 = scmp.ne.s32.totalorder %s371_s13, %s2212_s15  ;;  %s2219_s16 = scalar_lea.vmem %s371_s13, 32 }
  0x25   : > { %p2684_p8 = pnand %p2021_p7, %p3140_p1  ;;  %p2220_p13 = scmp.lt.s32.totalorder %s371_s13, %s371_s13 }
  0x26   : > { %p2221_p0 = scmp.lt.s32.totalorder %s2219_s16, %s2212_s15 }
  0x27   : > { %p3125_p9 = pneg %p2684_p8 }
  0x28   : > { %p2222_p3 = por %p2221_p0, %p2220_p13 }
  0x29   : > { %p2215_p11 = pnand %p2213_p10, %p3125_p9 }
  0x2b   : > { %p2216_p12 = pneg %p2215_p11 }
  0x2d   : > { %p2223_p4 = pnand %p2222_p3, %p2216_p12 }
  0x2f   : > { %2226 = shalt.err (!%p2223_p4)
}
  0x30   : > { %s3178_s4 = sld [smem:[#allocation40_spill]]  ;;  %s1801_s15 = sadd.s32 4294967294, %s2525_s27  }
  0x31   : > { %p69_p7 = scmp.ne.s32.totalorder %s2505_s22, %s2501_s21  ;;  %p70_p10 = scmp.eq.s32.totalorder %s2525_s27, 0 }
  0x32   : > { %p75_p11 = scmp.ne.s32.totalorder %s2501_s21, %s3165_s20  ;;  %p283_p12 = scmp.ne.s32.totalorder %s2493_s19, %s2489_s18 }
  0x33   : > { %p2710_p13 = por %p341_p2, %p69_p7  ;;  %p71_p0 = por %p70_p10, %p69_p7 }
  0x34   : > { %p2716_p3 = por %p3140_p1, %p75_p11  ;;  %p2720_p4 = por %p283_p12, %p70_p10 }
  0x35   : > { %s3179_s12 = scalar_select %p2710_p13, 1, 0 }
  0x36   : > { %2024 = dma.hbm_to_vmem [thread:$0]  (!%p2684_p8), %s3178_s4, 16, %s371_s13, [#allocation13]  }
  0x37   : > { %3180 = sst [smem:[#allocation33_spill]] %s3179_s12  ;;  %p347_p9 = scmp.eq.s32.totalorder %s1801_s15, 3 }
  0x38   : > { %s3181_s13 = scalar_select %p2716_p3, 1, 0 }
  0x39   : > { %p3141_p5 = scmp.lt.s32.totalorder %s2525_s27, 4  ;;  %s3135_s17 = sand.u32 1, %s2505_s22  }
  0x3a   : > { %3182 = sst [smem:[#allocation34_spill]] %s3181_s13  ;;  %p2726_p6 = por %p347_p9, %p75_p11 }
  0x3b   : > { %s2732_s20 = sshll.u32 %s3135_s17, 2  ;;  %s2735_s11 = sshll.u32 %s2521_s26, 6 }
  0x3c   : > { %s3184_s4 = scalar_select %p2726_p6, 1, 0 }
  0x3d   : > { %p2739_p2 = pnand %p3141_p5, %p71_p0  ;;  %s3142_s15 = sand.u32 1, %s2525_s27  }
  0x3e   : > { %3185 = sst [smem:[#allocation35_spill]] %s3184_s4  ;;  %s418_s4 = scalar_lea.vmem [#allocation9], %s2732_s20 }
  0x3f   : > { %s3187_s1 = sld [smem:[#allocation38_spill]]  ;;  %s425_s8 = sshll.u32 %s418_s4, 4  ;;  %s426_s8 = int_to_ptr.vmem [resolvable:$true] %s425_s8 }
  0x40   : > { %s2751_s17 = scalar_lea.sflag [#allocation10], %s3142_s15  ;;  %p3150_p9 = pneg %p2739_p2 }
  0x41   : > { %s2240_s7 = scalar_lea.vmem %s426_s8, 64  ;;  %s2528_s23 = smov [#allocation9]  }
  0x42   : > { %p2241_p7 = scmp.ne.s32.totalorder %s426_s8, %s2240_s7  ;;  %s2245_s29 = sshll.u32 %s2528_s23, 4  ;;  %s2246_s29 = int_to_ptr.vmem [resolvable:$false] %s2245_s29 }
  0x43   : > { %s2247_s18 = scalar_lea.vmem %s2246_s29, 128  ;;  %p2248_p12 = scmp.lt.s32.totalorder %s426_s8, %s2246_s29 }
  0x44   : > { %p2243_p10 = pnand %p2241_p7, %p3150_p9  ;;  %p2249_p0 = scmp.lt.s32.totalorder %s2247_s18, %s2240_s7 }
  0x45   : > { %s423_s5 = scalar_lea.hbm %s3187_s1, %s2735_s11 }
  0x46   : > { %p2244_p11 = pneg %p2243_p10  ;;  %p2250_p1 = por %p2249_p0, %p2248_p12 }
  0x48   : > { %p2251_p5 = pnand %p2250_p1, %p2244_p11 }
  0x4a   : > { %2254 = shalt.err (!%p2251_p5)
}
  0x4b   : > { %2034 = dma.hbm_to_vmem [thread:$0]  (!%p2739_p2), %s423_s5, 64, %s426_s8, %s2751_s17  }
  0x4c   : > { %p3188_p7 = scmp.lt.s32.totalorder %s2525_s27, 4  ;;  %s276_s4 = sadd.s32 1, %s2493_s19 }
  0x4d   : > { %s49_s7 = sadd.s32 1, %s2517_s25  ;;  %s468_s18 = sand.u32 1, %s2493_s19  }
  0x4e   : > { %p2765_p10 = pnand %p3188_p7, %p2720_p4  ;;  %p51_p1 = scmp.ge.s32.totalorder %s49_s7, 2 }
  0x4f   : > { %s2772_s23 = sshll.u32 %s468_s18, 4  ;;  %s1866_s24 = sshll.u32 %s2517_s25, 8 }
  0x50   : > { %s3244_s7 = smov (%p51_p1, %s49_s7), 0  ;;  %s3191_s5 = sadd.s32 1, %s2521_s26 }
  0x51   : > { %3190 = sst [smem:[#allocation36_spill]] %s3244_s7  ;;  %s3246_s5 = smov (!%p51_p1, %s3191_s5), %s2521_s26 }
  0x52   : > { %s273_s8 = ssub.s32 %s2517_s25, %s3244_s7  ;;  %p55_p5 = scmp.ge.s32.totalorder %s3246_s5, 2 }
  0x53   : > { %p274_p4 = scmp.eq.s32.totalorder %s273_s8, 0  ;;  %s3192_s9 = sld [smem:[#allocation44_spill]] }
  0x54   : > { %s470_s18 = scalar_lea.vmem [#allocation15], %s2772_s23  ;;  %s3248_s5 = smov (%p55_p5, %s3246_s5), 0 }
  0x55   : > { %s477_s1 = sshll.u32 %s470_s18, 4  ;;  %3193 = sst [smem:[#allocation37_spill]] %s3248_s5  ;;  %s478_s1 = int_to_ptr.vmem [resolvable:$true] %s477_s1 }
  0x56   : > { %s2793_s28 = scalar_select %p274_p4, %s2493_s19, %s276_s4  }
  0x57   : > { %s57_s13 = ssub.s32 %s2521_s26, %s3248_s5  ;;  %s3194_s7 = sadd.s32 1, %s2505_s22 }
  0x58   : > { %p60_p11 = scmp.eq.s32.totalorder %s57_s13, 0  ;;  %s3195_s8 = sand.u32 1, %s2525_s27  }
  0x59   : > { %s2787_s15 = scalar_lea.hbm %s3192_s9, %s1866_s24  ;;  %s2804_s30 = scalar_lea.sflag [#allocation16], %s3195_s8 }
  0x5a   : > { %s2800_s21 = scalar_select %p60_p11, %s2505_s22, %s3194_s7  }
  0x5b   : > { %p3153_p12 = pneg %p2765_p10  ;;  %s2268_s29 = scalar_lea.vmem %s478_s1, 256 }
  0x5c   : > { %p2269_p0 = scmp.ne.s32.totalorder %s478_s1, %s2268_s29  ;;  %s2529_s16 = smov [#allocation15]  }
  0x5d   : > { %s2273_s4 = sshll.u32 %s2529_s16, 4  ;;  %s2274_s4 = int_to_ptr.vmem [resolvable:$false] %s2273_s4 }
  0x5e   : > { %p2271_p7 = pnand %p2269_p0, %p3153_p12  ;;  %s2275_s18 = scalar_lea.vmem %s2274_s4, 512 }
  0x5f   : > { %p2276_p5 = scmp.lt.s32.totalorder %s478_s1, %s2274_s4  ;;  %p2277_p4 = scmp.lt.s32.totalorder %s2275_s18, %s2268_s29 }
  0x60   : > { %p2272_p1 = pneg %p2271_p7 }
  0x61   : > { %p2278_p9 = por %p2277_p4, %p2276_p5 }
  0x63   : > { %p2279_p11 = pnand %p2278_p9, %p2272_p1 }
  0x65   : > { %2282 = shalt.err (!%p2279_p11)
}
  0x66   : > { %s3154_s13 = smov 64   ;;  %s2531_s7 = smov 4  }
  0x67   : > { %2040 = dma.hbm_to_vmem [thread:$0]  (!%p2765_p10), %s2787_s15, 256, %s478_s1, %s2804_s30, %s3154_s13, %s3154_s13, %s2531_s7  }
  0x68   : > { %s2823_s29 = scalar_lea.hbm %s3123_s10, %s1866_s24  ;;  %s491_s4 = scalar_lea.vmem [#allocation17], %s2772_s23 }
  0x69   : > { %s498_s18 = sshll.u32 %s491_s4, 4  ;;  %s2532_s9 = smov [#allocation14]   ;;  %s2826_s18 = int_to_ptr.vmem [resolvable:$true] %s498_s18 }
  0x6a   : > { %s384_s5 = sshll.u32 %s2532_s9, 4  ;;  %p3196_p0 = pneg %p2684_p8  ;;  %s385_s5 = int_to_ptr.vmem [resolvable:$true] %s384_s5 }
  0x6b   : > { %s2294_s26 = scalar_lea.vmem %s385_s5, 16  ;;  %s2301_s1 = scalar_lea.vmem %s385_s5, 32 }
  0x6c   : > { %p2295_p9 = scmp.ne.s32.totalorder %s385_s5, %s2294_s26  ;;  %p2302_p5 = scmp.lt.s32.totalorder %s385_s5, %s385_s5 }
  0x6d   : > { %p2303_p4 = scmp.lt.s32.totalorder %s2301_s1, %s2294_s26 }
  0x6e   : > { %p2297_p7 = pnand %p2295_p9, %p3196_p0 }
  0x6f   : > { %p2304_p11 = por %p2303_p4, %p2302_p5 }
  0x70   : > { %p2298_p1 = pneg %p2297_p7 }
  0x72   : > { %p2305_p12 = pnand %p2304_p11, %p2298_p1 }
  0x74   : > { %2308 = shalt.err (!%p2305_p12)
}
  0x75   : > { %2027 = dma.hbm_to_vmem [thread:$0]  (!%p2684_p8), %s3119_s6, 16, %s385_s5, [#allocation13]  }
  0x76   : > { %s405_s8 = scalar_lea.hbm %s3113_s0, %s2735_s11  ;;  %s399_s16 = scalar_lea.vmem [#allocation6], %s2732_s20 }
  0x77   : > { %s407_s4 = sshll.u32 %s399_s16, 4  ;;  %s3197_s26 = sand.u32 1, %s2505_s22   ;;  %s408_s4 = int_to_ptr.vmem [resolvable:$true] %s407_s4 }
  0x78   : > { %s396_s1 = scalar_lea.sflag [#allocation7], %s3197_s26  ;;  %s2322_s13 = scalar_lea.vmem %s408_s4, 64 }
  0x79   : > { %p2323_p12 = scmp.ne.s32.totalorder %s408_s4, %s2322_s13  ;;  %p3198_p9 = pneg %p2739_p2 }
  0x7a   : > { %s2533_s14 = smov [#allocation6]  }
  0x7b   : > { %p2325_p0 = pnand %p2323_p12, %p3198_p9  ;;  %s2327_s15 = sshll.u32 %s2533_s14, 4  ;;  %s2328_s15 = int_to_ptr.vmem [resolvable:$false] %s2327_s15 }
  0x7c   : > { %s2329_s23 = scalar_lea.vmem %s2328_s15, 128  ;;  %p2330_p8 = scmp.lt.s32.totalorder %s408_s4, %s2328_s15 }
  0x7d   : > { %p2326_p7 = pneg %p2325_p0  ;;  %p2331_p1 = scmp.lt.s32.totalorder %s2329_s23, %s2322_s13 }
  0x7f   : > { %p2332_p5 = por %p2331_p1, %p2330_p8 }
  0x81   : > { %p2333_p4 = pnand %p2332_p5, %p2326_p7 }
  0x83   : > { %2336 = shalt.err (!%p2333_p4)
}
  0x84   : > { %2031 = dma.hbm_to_vmem [thread:$0]  (!%p2739_p2), %s405_s8, 64, %s408_s4, %s396_s1  }
  0x85   : > { %s441_s24 = scalar_lea.hbm %s3115_s2, %s2735_s11  ;;  %s436_s16 = scalar_lea.vmem [#allocation11], %s2732_s20 }
  0x86   : > { %s443_s26 = sshll.u32 %s436_s16, 4  ;;  %p3199_p12 = pmov %p3198_p9  ;;  %s444_s26 = int_to_ptr.vmem [resolvable:$true] %s443_s26 }
  0x87   : > { %s2350_s14 = scalar_lea.vmem %s444_s26, 64  ;;  %s2534_s13 = smov [#allocation11]  }
  0x88   : > { %p2351_p11 = scmp.ne.s32.totalorder %s444_s26, %s2350_s14  ;;  %s2355_s15 = sshll.u32 %s2534_s13, 4  ;;  %s2356_s15 = int_to_ptr.vmem [resolvable:$false] %s2355_s15 }
  0x89   : > { %s2357_s23 = scalar_lea.vmem %s2356_s15, 128  ;;  %p2358_p7 = scmp.lt.s32.totalorder %s444_s26, %s2356_s15 }
  0x8a   : > { %p2353_p9 = pnand %p2351_p11, %p3199_p12  ;;  %p2359_p8 = scmp.lt.s32.totalorder %s2357_s23, %s2350_s14 }
  0x8c   : > { %p2354_p0 = pneg %p2353_p9  ;;  %p2360_p1 = por %p2359_p8, %p2358_p7 }
  0x8e   : > { %p2361_p5 = pnand %p2360_p1, %p2354_p0 }
  0x90   : > { %2364 = shalt.err (!%p2361_p5)
}
  0x91   : > { %2037 = dma.hbm_to_vmem [thread:$0]  (!%p2739_p2), %s441_s24, 64, %s444_s26, %s2751_s17  }
  0x92   : > { %s2378_s11 = scalar_lea.vmem %s2826_s18, 256  ;;  %p3200_p11 = pneg %p2765_p10 }
  0x93   : > { %p2379_p4 = scmp.ne.s32.totalorder %s2826_s18, %s2378_s11  ;;  %s2535_s20 = smov [#allocation17]  }
  0x94   : > { %s2383_s8 = sshll.u32 %s2535_s20, 4  ;;  %s2384_s8 = int_to_ptr.vmem [resolvable:$false] %s2383_s8 }
  0x95   : > { %p2381_p12 = pnand %p2379_p4, %p3200_p11  ;;  %s2385_s4 = scalar_lea.vmem %s2384_s8, 512 }
  0x96   : > { %p2386_p0 = scmp.lt.s32.totalorder %s2826_s18, %s2384_s8  ;;  %p2387_p7 = scmp.lt.s32.totalorder %s2385_s4, %s2378_s11 }
  0x97   : > { %p2382_p9 = pneg %p2381_p12 }
  0x98   : > { %p2388_p8 = por %p2387_p7, %p2386_p0 }
  0x9a   : > { %p2389_p1 = pnand %p2388_p8, %p2382_p9 }
  0x9c   : > { %2392 = shalt.err (!%p2389_p1)
}
  0x9d   : > { %s3201_s12 = smov 64   ;;  %s3202_s17 = sld [smem:[#allocation32_spill]] }
  0x9e   : > { %2043 = dma.hbm_to_vmem [thread:$0]  (!%p2765_p10), %s2823_s29, 256, %s2826_s18, %s2804_s30, %s3201_s12, %s3201_s12, %s2531_s7  }
  0xa3   : > { %p3203_p2 = scmp.ne.s32.totalorder %s3202_s17, 0 }
  0xa4   : > { %s3204_s1 = sld [smem:[#allocation26_spill]] (!%p3203_p2) }
  0xa5   : > { %510 = sbr.rel (%p3203_p2) target bundleno = 2364 (0x93c), region = 64 }
  0xaa   : > { %s2876_s9 = sand.u32 1, %s3204_s1  }
  0xab   : > { %s2879_s24 = sshll.u32 %s2876_s9, 2  ;;  %s513_s3 = scalar_lea.sflag [#allocation7], %s2876_s9 }
  0xac   : > { %2464 = dma.done.wait (%p2716_p3), %s513_s3, 64  }
  0xad   : > { %2466 = vsyncadd (%p2716_p3), %s513_s3, 4294967232  ;;  %s3206_s30 = sld [smem:[#allocation30_spill]]  ;;  %s525_s18 = scalar_lea.vmem [#allocation9], %s2879_s24 }
  0xb3   : > { %s521_s7 = sand.u32 1, %s3206_s30  }
  0xb4   : > { %s522_s29 = scalar_lea.sflag [#allocation10], %s521_s7 }
  0xb5   : > { %2468 = dma.done.wait (%p2716_p3), %s522_s29, 128  }
  0xb6   : > { %2470 = vsyncadd (%p2716_p3), %s522_s29, 4294967168  ;;  %p3207_p10 = scmp.eq.s32.totalorder %s3206_s30, 0 }
  0xb8   : > { %2472 = dma.done.wait (%p3207_p10), [#allocation13], 32   ;;  %p3208_p5 = pmov %p3207_p10 }
  0xb9   : > { %s3209_s14 = sld [smem:[#allocation24_spill]]  ;;  %s548_s11 = scalar_lea.sflag [#allocation16], %s521_s7 }
  0xba   : > { %2474 = vsyncadd (%p3208_p5), [#allocation13], 4294967264  ;;  %s3210_s13 = sld [smem:[#allocation31_spill]] }
  0xbf   : > { %s549_s15 = sand.u32 1, %s3209_s14  }
  0xc0   : > { %s2899_s23 = sshll.u32 %s549_s15, 4  ;;  %p3211_p4 = scmp.ne.s32.totalorder %s3210_s13, 0 }
  0xc2   : > { %2476 = dma.done.wait (%p3211_p4), %s548_s11, 512  }
  0xc3   : > { %2478 = vsyncadd (%p3211_p4), %s548_s11, 4294966784  ;;  %s3212_s8 = sld [smem:[#allocation27_spill]]  ;;  %s1826_s4 = sshll.u32 %s2876_s9, 3 }
  0xc4   : > { %s3213_s5 = sld [smem:[#allocation42_spill]]  ;;  %s560_s13 = scalar_lea.vmem [#allocation17], %s2899_s23 }
  0xc5   : > { %s3214_s29 = sld [smem:[#allocation43_spill]]  ;;  %s2921_s15 = scalar_lea.vmem [#allocation18], %s1826_s4 }
  0xc9   : > { %p629_p3 = scmp.lt.s32.totalorder %s3212_s8, 1  ;;  %p640_p11 = scmp.eq.s32.totalorder %s3212_s8, 0 }
  0xca   : > { %s3215_s26 = sld [smem:[#allocation41_spill]] (%p640_p11)  ;;  %v2536_v1 = vmov (%p640_p11), 0.0   ;;  %vm668_vm0 = vcmask (%p640_p11), 195584   ;;  %vm2537_vm1 = vmmov (%p640_p11), 0   ;;  %v646_v5 = vld [vmem:[%s525_s18] sm:$0xf] (%p640_p11) }
  0xcb   : > { %s3250_s8 = smov (!%p629_p3, %s3212_s8), 1  ;;  %645 = sbr.rel (!%p640_p11) target bundleno = 424 (0x1a8), region = 96  ;;  %1905 = vmatprep.subr.bf16.mxu0 (%p640_p11), %v2536_v1  ;;  %1909 = vmatprep.mubr.msk.bf16.mxu0 (%p640_p11), %vm2537_vm1, %v2536_v1  ;;  %v1832_v6 = vld [vmem:[#allocation14] ss:$0 sm:$0xff] (%p640_p11)  ;;  %vm719_vm2 = vcmask (%p640_p11), 257024  }
  0xcc   : > { %s1868_s12 = sshll.u32 %s3250_s8, 4 }
  0xcd   : > { %s2913_s3 = scalar_lea.vmem %s3213_s5, %s1868_s12  ;;  %s2918_s14 = scalar_lea.vmem %s3214_s29, %s1868_s12 }
  0xd0   : > { %s3216_s20 = smov %s3215_s26  ;;  %v2158_v0 = vld [vmem:[%s3215_s26 + $0x8] sm:$0xff]  }
  0xd1   : > { %v676_v2 = vsel %vm668_vm0, %v2158_v0, 0  ;;  %v2159_v3 = vld [vmem:[%s3216_s20] sm:$0xff]  }
  0xd2   : > { %1906 = vmatpush3.bf16.xpose.msra.mxu0 %v676_v2  ;;  %v673_v4 = vsel %vm668_vm0, %v2159_v3, 0 }
  0xd3   : > { %1907 = vmatprep.subr.bf16.mxu0 %v2536_v1 }
  0xda   : > { %1908 = vmatpush3.bf16.xpose.msra.mxu0 %v673_v4 }
  0xe1   : > { %1910 = vmatmul.mubr.msk.bf16.vlgmr.msra.gmra.mxu0 %vm668_vm0, %v646_v5 }
 0x1a1   : > { %v712_v7 = vpop.f32.mrf.mxu0 }
 0x1a2   : > { %v713_v8 = vadd.f32 %v1832_v6, %v712_v7 }
 0x1a3   : > { %v1911_v9 = vpop.f32.mrf.mxu0 }
 0x1a4   : > { %v718_v10 = vpack.c.bf16 %v713_v8, %v713_v8 }
 0x1a5   : > { %v715_v11 = vpop.f32.mrf.mxu0 }
 0x1a6   : > { %720 = vst.msk [vmem:[#allocation3] sm:$0xf] %vm719_vm2, %v718_v10 }
 0x1a7   : > { %v1912_v12 = vpop.f32.mrf.mxu0 }
 0x1a8 PF: > { %v2175_v13 = vld [vmem:[%s2918_s14 + $0x8] sm:$0xff]   ;;  %v2538_v14 = vmov 0.0   ;;  %vm739_vm3 = vcmask 261120   ;;  %s3217_s16 = scalar_lea.vmem [#allocation15], %s2899_s23  ;;  %v2177_v18 = vld [vmem:[%s2918_s14] sm:$0xff]   ;;  %vm2539_vm4 = vmmov 0  }
 0x1a9   : > { %1913 = vmatprep.subr.bf16.mxu0 %v2538_v14  ;;  %1921 = vmatprep.subr.bf16.mxu1 %v2538_v14  ;;  %v2176_v15 = vld [vmem:[%s3217_s16 + $0x8] sm:$0xff]   ;;  %v747_v16 = vsel %vm739_vm3, %v2175_v13, 0  ;;  %s3218_s18 = smov %s3217_s16  ;;  %v744_v20 = vsel %vm739_vm3, %v2177_v18, 0  ;;  %s3219_s26 = scalar_lea.vmem [#allocation11], %s2879_s24  ;;  %vm803_vm5 = vcmask 60416  }
 0x1aa   : > { %1914 = vmatpush3.bf16.xpose.msra.mxu0 %v747_v16  ;;  %v830_v17 = vsel %vm739_vm3, %v2176_v15, 0  ;;  %v2178_v19 = vld [vmem:[%s3218_s18] sm:$0xff]   ;;  %1917 = vmatprep.mubr.msk.bf16.mxu0 %vm2539_vm4, %v2538_v14  ;;  %s2540_s4 = smov 104   ;;  %s2541_s17 = smov 120  }
 0x1ab   : > { %1922 = vmatpush3.bf16.xpose.msra.mxu1 %v830_v17  ;;  %1915 = vmatprep.subr.bf16.mxu0 %v2538_v14  ;;  %v827_v21 = vsel %vm739_vm3, %v2178_v19, 0  ;;  %v808_v23 = vld [vmem:[%s3219_s26] sm:$0xf]  ;;  %s2542_s1 = smov 112   ;;  %s3220_s5 = sld [smem:[#allocation27_spill]] }
 0x1ac   : > { %1923 = vmatprep.subr.bf16.mxu1 %v2538_v14  ;;  %1925 = vmatprep.mubr.msk.bf16.mxu1 %vm2539_vm4, %v2538_v14 }
 0x1ad   : > { %v724_v22 = vld [vmem:[#allocation3] sm:$0xf] }
 0x1b1   : > { %p1842_p12 = scmp.ne.s32.totalorder %s3220_s5, 0 }
 0x1b2   : > { %1916 = vmatpush3.bf16.xpose.msra.mxu0 %v744_v20  ;;  %s3221_s29 = sld [smem:[#allocation39_spill]] (!%p1842_p12)  ;;  %s3222_s8 = scalar_lea.vmem (!%p1842_p12), [#allocation6], %s2879_s24 }
 0x1b3   : > { %1924 = vmatpush3.bf16.xpose.msra.mxu1 %v827_v21 }
 0x1b9   : > { %1918 = vmatmul.mubr.msk.bf16.vlgmr.msra.gmra.mxu0 %vm739_vm3, %v724_v22 }
 0x1ba   : > { %1926 = vmatmul.mubr.msk.bf16.vlgmr.msra.gmra.mxu1 %vm739_vm3, %v808_v23 }
 0x279   : > { %v783_v24 = vpop.f32.mrf.mxu0 }
 0x27a   : > { %v799_v25 = vpack.c.bf16 %v783_v24, %v783_v24  ;;  %v866_v26 = vpop.f32.mrf.mxu1 }
 0x27b   : > { %v882_v27 = vpack.c.bf16 %v866_v26, %v866_v26  ;;  %v1919_v28 = vpop.f32.mrf.mxu0  ;;  %v2170_v29 = vpack.i.bf16 %v866_v26, %v783_v24 }
 0x27c   : > { %804 = vst.msk [vmem:[#allocation4] sm:$0xf] %vm803_vm5, %v799_v25  ;;  %v1927_v30 = vpop.f32.mrf.mxu1 }
 0x27d   : > { %886 = vst.msk [vmem:[#allocation5] sm:$0xf] %vm803_vm5, %v882_v27  ;;  %2171 = vrot.lane.b32.xlu1 %v2170_v29, %s2540_s4  ;;  %2161 = vrot.lane.b32.xlu0 %v2170_v29, %s2541_s17  ;;  %v786_v31 = vpop.f32.mrf.mxu0 }
 0x27e   : > { %v869_v32 = vpop.f32.mrf.mxu1 }
 0x27f   : > { %v1920_v33 = vpop.f32.mrf.mxu0 }
 0x280   : > { %v1928_v34 = vpop.f32.mrf.mxu1 }
 0x281   : > { %2166 = vrot.lane.b32.xlu0 %v2170_v29, %s2542_s1 }
 0x2ef   : > { %v2172_v35 = vpop.permute.xlu1 %2171  ;;  %v2162_v36 = vpop.permute.xlu0 %2161 }
 0x2f0   : > { %v2174_v37 = vunpack.i.h.bf16 %v2172_v35  ;;  %v2173_v38 = vunpack.i.l.bf16 %v2172_v35  ;;  %v2164_v39 = vunpack.i.h.bf16 %v2162_v36  ;;  %v2163_v40 = vunpack.i.l.bf16 %v2162_v36 }
 0x2f2   : > { %v885_v41 = vpack.c.bf16 %v2174_v37, %v2174_v37  ;;  %v802_v42 = vpack.c.bf16 %v2173_v38, %v2173_v38  ;;  %v883_v43 = vpack.c.bf16 %v2164_v39, %v2164_v39  ;;  %v800_v44 = vpack.c.bf16 %v2163_v40, %v2163_v40 }
 0x2f3   : > { %v2167_v45 = vpop.permute.xlu0 %2166 }
 0x2f4   : > { %889 = vst.msk [vmem:[#allocation5 + $0xc] sm:$0xf] %vm803_vm5, %v885_v41  ;;  %807 = vst.msk [vmem:[#allocation4 + $0xc] sm:$0xf] %vm803_vm5, %v802_v42  ;;  %v2169_v46 = vunpack.i.h.bf16 %v2167_v45  ;;  %v2168_v47 = vunpack.i.l.bf16 %v2167_v45  ;;  %893 = sbr.rel (%p1842_p12) target bundleno = 977 (0x3d1), region = 104 }
 0x2f5   : > { %887 = vst.msk [vmem:[#allocation5 + $0x4] sm:$0xf] %vm803_vm5, %v883_v43  ;;  %805 = vst.msk [vmem:[#allocation4 + $0x4] sm:$0xf] %vm803_vm5, %v800_v44 }
 0x2f6   : > { %v884_v48 = vpack.c.bf16 %v2169_v46, %v2169_v46  ;;  %v801_v49 = vpack.c.bf16 %v2168_v47, %v2168_v47 }
 0x2f8   : > { %888 = vst.msk [vmem:[#allocation5 + $0x8] sm:$0xf] %vm803_vm5, %v884_v48  ;;  %806 = vst.msk [vmem:[#allocation4 + $0x8] sm:$0xf] %vm803_vm5, %v801_v49 }
 0x2f9   : > { %v2179_v50 = vld [vmem:[%s3221_s29 + $0x8] sm:$0xff]   ;;  %v2543_v51 = vmov 0.0   ;;  %vm916_vm6 = vcmask 130048   ;;  %vm2544_vm7 = vmmov 0   ;;  %v2180_v53 = vld [vmem:[%s3221_s29] sm:$0xff]  }
 0x2fa   : > { %1929 = vmatprep.subr.bf16.mxu0 %v2543_v51  ;;  %v924_v52 = vsel %vm916_vm6, %v2179_v50, 0  ;;  %1933 = vmatprep.mubr.msk.bf16.mxu0 %vm2544_vm7, %v2543_v51  ;;  %v921_v54 = vsel %vm916_vm6, %v2180_v53, 0  ;;  %v894_v55 = vld [vmem:[%s3222_s8] sm:$0xf]  ;;  %v1843_v56 = vld [vmem:[#allocation12] ss:$0 sm:$0xff] }
 0x2fb   : > { %1930 = vmatpush3.bf16.xpose.msra.mxu0 %v924_v52 }
 0x2fc   : > { %1931 = vmatprep.subr.bf16.mxu0 %v2543_v51 }
 0x303   : > { %1932 = vmatpush3.bf16.xpose.msra.mxu0 %v921_v54 }
 0x30a   : > { %1934 = vmatmul.mubr.msk.bf16.vlgmr.msra.gmra.mxu0 %vm916_vm6, %v894_v55 }
 0x3ca   : > { %v960_v57 = vpop.f32.mrf.mxu0 }
 0x3cb   : > { %v961_v58 = vadd.f32 %v1843_v56, %v960_v57 }
 0x3cc   : > { %v1935_v59 = vpop.f32.mrf.mxu0 }
 0x3cd   : > { %968 = vst.msk [vmem:[#allocation2] sm:$0xff] %vm739_vm3, %v961_v58 }
 0x3ce   : > { %v963_v60 = vpop.f32.mrf.mxu0 }
 0x3d0   : > { %v1936_v61 = vpop.f32.mrf.mxu0 }
 0x3d1 PF: > { %1937 = vmatprep.subr.bf16.mxu0 %v2538_v14  ;;  %v2181_v62 = vld [vmem:[%s2913_s3 + $0x8] sm:$0xff]   ;;  %1941 = vmatprep.mubr.msk.bf16.mxu0 %vm2539_vm4, %v2538_v14  ;;  %vm1054_vm8 = vcmask 64512   ;;  %v2182_v2 = vld [vmem:[%s2913_s3] sm:$0xff]   ;;  %v1287_v49 = vld [vmem:[#allocation5] sm:$0xf]  ;;  %vm1294_vm9 = vcmask 1043456  }
 0x3d2   : > { %1945 = vmatprep.subr.bf16.mxu1 %v2538_v14  ;;  %1947 = vmatprep.mubr.msk.bf16.mxu1 %vm2539_vm4, %v2538_v14  ;;  %v994_v63 = vsel %vm739_vm3, %v2181_v62, 0  ;;  %v1050_v0 = vld [vmem:[#allocation4] sm:$0xf]  ;;  %v991_v3 = vsel %vm739_vm3, %v2182_v2, 0  ;;  %v1296_v50 = vsel %vm1294_vm9, %v1287_v49, 0  ;;  %s2545_s24 = smov 8  }
 0x3d3   : > { %1938 = vmatpush3.bf16.xpose.msra.mxu0 %v994_v63  ;;  %v1059_v1 = vsel %vm1054_vm8, %v1050_v0, 0  ;;  %v1053_v19 = vld [vmem:[#allocation4 + $0xc] sm:$0xf]  ;;  %s2546_s3 = smov 16   ;;  %s2547_s12 = smov 24   ;;  %vm1489_vm10 = vcmask 130048  }
 0x3d4   : > { %1939 = vmatprep.subr.bf16.mxu0 %v2538_v14  ;;  %1946 = vmatpush3.bf16.xpose.msra.mxu1 %v1059_v1  ;;  %v970_v4 = vld [vmem:[#allocation2] sm:$0xff]  ;;  %v1051_v6 = vld [vmem:[#allocation4 + $0x4] sm:$0xf]  ;;  %v1197_v21 = vsel %vm1054_vm8, %v1053_v19, 0  ;;  %vm1491_vm11 = vcmask 195584   ;;  %s3223_s23 = sld [smem:[#allocation27_spill]] }
 0x3d5   : > { %1951 = vmatprep.subr.bf16.mxu1 %v2538_v14  ;;  %v971_v5 = vpack.c.bf16 %v970_v4, %v970_v4  ;;  %v1105_v9 = vsel %vm1054_vm8, %v1051_v6, 0  ;;  %v1288_v2 = vld [vmem:[#allocation5 + $0x4] sm:$0xf] }
 0x3d7   : > { %v1052_v13 = vld [vmem:[#allocation4 + $0x8] sm:$0xf]  ;;  %v1289_v6 = vld [vmem:[#allocation5 + $0x8] sm:$0xf] }
 0x3d8   : > { %v1151_v17 = vsel %vm1054_vm8, %v1052_v13, 0 }
 0x3da   : > { %p1861_p9 = scmp.ne.s32.totalorder %s3223_s23, 1 }
 0x3db   : > { %1940 = vmatpush3.bf16.xpose.msra.mxu0 %v991_v3  ;;  %v1342_v3 = vsel %vm1294_vm9, %v1288_v2, 0 }
 0x3dc   : > { %1969 = vmatprep.subr.bf16.mxu0 %v2538_v14 }
 0x3e2   : > { %1942 = vmatmul.mubr.msk.bf16.vlgmr.msra.gmra.mxu0 %vm739_vm3, %v971_v5 }
 0x3e3   : > { %1971 = vmatprep.mubr.msk.bf16.mxu0 %vm2539_vm4, %v2538_v14  ;;  %1970 = vmatpush3.bf16.msra.mxu0 %v1296_v50 }
 0x3e4   : > { %1981 = vmatprep.subr.bf16.mxu0 %v2538_v14 }
 0x4a2   : > { %v2991_v7 = vpop.f32.mrf.mxu0 }
 0x4a3   : > { %1043 = vrot.lane.b32.xlu1 %v2991_v7, %s2540_s4  ;;  %1037 = vrot.lane.b32.xlu0 %v2991_v7, %s2541_s17  ;;  %v1046_v8 = vpack.c.bf16 %v2991_v7, %v2991_v7 }
 0x4a4   : > { %v1943_v10 = vpop.f32.mrf.mxu0 }
 0x4a5   : > { %1948 = vmatmul.mubr.msk.bf16.vlgmr.msra.gmra.mxu1 %vm1054_vm8, %v1046_v8  ;;  %v1388_v10 = vsel %vm1294_vm9, %v1289_v6, 0 }
 0x4a6   : > { %v1033_v11 = vpop.f32.mrf.mxu0  ;;  %1952 = vmatpush3.bf16.xpose.msra.mxu1 %v1105_v9  ;;  %1953 = vmatprep.mubr.msk.bf16.mxu1 %vm2539_vm4, %v2538_v14 }
 0x4a7   : > { %1040 = vrot.lane.b32.xlu0 %v2991_v7, %s2542_s1  ;;  %1957 = vmatprep.subr.bf16.mxu1 %v2538_v14 }
 0x4a8   : > { %v1944_v12 = vpop.f32.mrf.mxu0 }
 0x515   : > { %v1038_v15 = vpop.permute.xlu0 %1037  ;;  %v1044_v22 = vpop.permute.xlu1 %1043 }
 0x516   : > { %v1047_v16 = vpack.c.bf16 %v1038_v15, %v1038_v15  ;;  %v1049_v23 = vpack.c.bf16 %v1044_v22, %v1044_v22  ;;  %v1290_v15 = vld [vmem:[#allocation5 + $0xc] sm:$0xf] }
 0x517   : > { %v1434_v19 = vsel %vm1294_vm9, %v1290_v15, 0 }
 0x518   : > { %1954 = vmatmul.mubr.msk.bf16.vlgmr.msra.gmra.mxu1 %vm1054_vm8, %v1047_v16 }
 0x519   : > { %1958 = vmatpush3.bf16.xpose.msra.mxu1 %v1151_v17  ;;  %1959 = vmatprep.mubr.msk.bf16.mxu1 %vm2539_vm4, %v2538_v14  ;;  %v1041_v18 = vpop.permute.xlu0 %1040 }
 0x51a   : > { %1963 = vmatprep.subr.bf16.mxu1 %v2538_v14  ;;  %v1048_v20 = vpack.c.bf16 %v1041_v18, %v1041_v18 }
 0x520   : > { %1960 = vmatmul.mubr.msk.bf16.vlgmr.msra.gmra.mxu1 %vm1054_vm8, %v1048_v20 }
 0x521   : > { %1964 = vmatpush3.bf16.xpose.msra.mxu1 %v1197_v21  ;;  %1965 = vmatprep.mubr.msk.bf16.mxu1 %vm2539_vm4, %v2538_v14 }
 0x522   : > { %1975 = vmatprep.subr.bf16.mxu1 %v2538_v14 }
 0x528   : > { %1966 = vmatmul.mubr.msk.bf16.vlgmr.msra.gmra.mxu1 %vm1054_vm8, %v1049_v23 }
 0x529   : > { %1977 = vmatprep.mubr.msk.bf16.mxu1 %vm2539_vm4, %v2538_v14  ;;  %1976 = vmatpush3.bf16.msra.mxu1 %v1342_v3 }
 0x52a   : > { %1987 = vmatprep.subr.bf16.mxu1 %v2538_v14 }
 0x565   : > { %v1095_v24 = vpop.f32.mrf.mxu1 }
 0x566   : > { %v1239_v25 = vsel %vm1054_vm8, %v1095_v24, -inf }
 0x567   : > { %1240 = vmax.xlane.f32.xlu1 %v1239_v25  ;;  %v1949_v26 = vpop.f32.mrf.mxu1 }
 0x569   : > { %v1098_v27 = vpop.f32.mrf.mxu1 }
 0x56b   : > { %v1950_v28 = vpop.f32.mrf.mxu1 }
 0x5d8   : > { %v1141_v29 = vpop.f32.mrf.mxu1 }
 0x5d9   : > { %v1242_v30 = vsel %vm1054_vm8, %v1141_v29, -inf }
 0x5da   : > { %1243 = vmax.xlane.f32.xlu0 %v1242_v30  ;;  %v1955_v31 = vpop.f32.mrf.mxu1  ;;  %v2183_v30 = vld [vmem:[%s560_s13 + $0x8] sm:$0xff]  }
 0x5db   : > { %v1516_v31 = vsel %vm739_vm3, %v2183_v30, 0 }
 0x5dc   : > { %v1144_v32 = vpop.f32.mrf.mxu1 }
 0x5dd   : > { %v2184_v32 = vld [vmem:[%s560_s13] sm:$0xff]  }
 0x5de   : > { %v1956_v33 = vpop.f32.mrf.mxu1 }
 0x5df   : > { %v1513_v33 = vsel %vm739_vm3, %v2184_v32, 0 }
 0x5e0   : > { %v1187_v34 = vpop.f32.mrf.mxu1 }
 0x5e1   : > { %v1245_v35 = vsel %vm1054_vm8, %v1187_v34, -inf }
 0x5e2   : > { %1246 = vmax.xlane.f32.xlu0 %v1245_v35  ;;  %v1961_v36 = vpop.f32.mrf.mxu1 }
 0x5e4   : > { %v1190_v37 = vpop.f32.mrf.mxu1 }
 0x5e6   : > { %v1962_v38 = vpop.f32.mrf.mxu1 }
 0x5e8   : > { %v1233_v39 = vpop.f32.mrf.mxu1 }
 0x5e9   : > { %v1248_v40 = vsel %vm1054_vm8, %v1233_v39, -inf }
 0x5ea   : > { %1249 = vmax.xlane.f32.xlu1 %v1248_v40  ;;  %v1967_v41 = vpop.f32.mrf.mxu1 }
 0x5ec   : > { %v1236_v42 = vpop.f32.mrf.mxu1 }
 0x5ee   : > { %v1968_v43 = vpop.f32.mrf.mxu1 }
 0x5f0   : > { %v1241_v44 = vpop.xlane.xlu1 %1240 }
 0x5f1   : > { %v1251_v45 = vsub.f32 %v1095_v24, %v1241_v44 }
 0x5f3   : > { %v1255_v46 = vmul.f32 1.442695, %v1251_v45 }
 0x5f5   : > { %2185 = vpow2.f32 %v1255_v46 }
 0x602   : > { %v2186_v47 = vpop.eup %2185 }
 0x603   : > { %v1263_v48 = vsel %vm1054_vm8, %v2186_v47, 0.0 }
 0x604   : > { %1264 = vadd.xlane.f32.xlu0 %v1263_v48 }
 0x663   : > { %v1244_v51 = vpop.xlane.xlu0 %1243 }
 0x664   : > { %v1252_v52 = vsub.f32 %v1141_v29, %v1244_v51 }
 0x666   : > { %v1257_v53 = vmul.f32 1.442695, %v1252_v52 }
 0x668   : > { %2187 = vpow2.f32 %v1257_v53 }
 0x66b   : > { %v1247_v54 = vpop.xlane.xlu0 %1246 }
 0x66c   : > { %v1253_v55 = vsub.f32 %v1187_v34, %v1247_v54 }
 0x66e   : > { %v1259_v56 = vmul.f32 1.442695, %v1253_v55 }
 0x670   : > { %2189 = vpow2.f32 %v1259_v56 }
 0x673   : > { %v1250_v57 = vpop.xlane.xlu1 %1249 }
 0x674   : > { %v1254_v58 = vsub.f32 %v1233_v39, %v1250_v57 }
 0x675   : > { %v2188_v59 = vpop.eup %2187 }
 0x676   : > { %v1261_v60 = vmul.f32 1.442695, %v1254_v58  ;;  %v1266_v61 = vsel %vm1054_vm8, %v2188_v59, 0.0 }
 0x677   : > { %1267 = vadd.xlane.f32.xlu1 %v1266_v61 }
 0x678   : > { %2191 = vpow2.f32 %v1261_v60 }
 0x67d   : > { %v2190_v62 = vpop.eup %2189 }
 0x67e   : > { %v1269_v63 = vsel %vm1054_vm8, %v2190_v62, 0.0 }
 0x67f   : > { %1270 = vadd.xlane.f32.xlu0 %v1269_v63 }
 0x685   : > { %v2192_v0 = vpop.eup %2191 }
 0x686   : > { %v1272_v1 = vsel %vm1054_vm8, %v2192_v0, 0.0 }
 0x687   : > { %1273 = vadd.xlane.f32.xlu1 %v1272_v1 }
 0x68d   : > { %v1265_v4 = vpop.xlane.xlu0 %1264 }
 0x68e   : > { %2193 = vrcp.f32 %v1265_v4 }
 0x69b   : > { %v2194_v5 = vpop.eup %2193 }
 0x69c   : > { %v1279_v8 = vmul.f32 %v2194_v5, %v2186_v47 }
 0x69e   : > { %v1283_v9 = vpack.c.bf16 %v1279_v8, %v1279_v8 }
 0x6a0   : > { %1972 = vmatmul.mubr.msk.bf16.vlgmr.msra.gmra.mxu0 %vm1054_vm8, %v1283_v9 }
 0x6a1   : > { %1982 = vmatpush3.bf16.msra.mxu0 %v1388_v10  ;;  %1983 = vmatprep.mubr.msk.bf16.mxu0 %vm2539_vm4, %v2538_v14 }
 0x6a2   : > { %1993 = vmatprep.subr.bf16.mxu0 %v2538_v14 }
 0x700   : > { %v1268_v11 = vpop.xlane.xlu1 %1267 }
 0x701   : > { %2195 = vrcp.f32 %v1268_v11 }
 0x708   : > { %v1271_v12 = vpop.xlane.xlu0 %1270 }
 0x709   : > { %2197 = vrcp.f32 %v1271_v12 }
 0x70e   : > { %v2196_v13 = vpop.eup %2195 }
 0x70f   : > { %v1280_v16 = vmul.f32 %v2196_v13, %v2188_v59 }
 0x710   : > { %v1274_v17 = vpop.xlane.xlu1 %1273 }
 0x711   : > { %2199 = vrcp.f32 %v1274_v17  ;;  %v1284_v18 = vpack.c.bf16 %v1280_v16, %v1280_v16 }
 0x713   : > { %1978 = vmatmul.mubr.msk.bf16.vlgmr.msra.gmra.mxu1 %vm1054_vm8, %v1284_v18 }
 0x714   : > { %1988 = vmatpush3.bf16.msra.mxu1 %v1434_v19  ;;  %1989 = vmatprep.mubr.msk.bf16.mxu1 %vm2539_vm4, %v2538_v14 }
 0x716   : > { %v2198_v20 = vpop.eup %2197 }
 0x717   : > { %v1281_v21 = vmul.f32 %v2198_v20, %v2190_v62 }
 0x719   : > { %v1285_v22 = vpack.c.bf16 %v1281_v21, %v1281_v21 }
 0x71b   : > { %1984 = vmatmul.mubr.msk.bf16.vlgmr.msra.gmra.mxu0 %vm1054_vm8, %v1285_v22 }
 0x71c   : > { %1997 = vmatprep.mubr.msk.bf16.mxu0 %vm2539_vm4, %v2538_v14  ;;  %1994 = vmatpush3.bf16.xpose.msra.mxu0 %v1516_v31 }
 0x71d   : > { %1995 = vmatprep.subr.bf16.mxu0 %v2538_v14 }
 0x71e   : > { %v2200_v23 = vpop.eup %2199 }
 0x71f   : > { %v1282_v24 = vmul.f32 %v2200_v23, %v2192_v0 }
 0x721   : > { %v1286_v25 = vpack.c.bf16 %v1282_v24, %v1282_v24 }
 0x723   : > { %1990 = vmatmul.mubr.msk.bf16.vlgmr.msra.gmra.mxu1 %vm1054_vm8, %v1286_v25 }
 0x724   : > { %1996 = vmatpush3.bf16.xpose.msra.mxu0 %v1513_v33 }
 0x760   : > { %v1332_v26 = vpop.f32.mrf.mxu0 }
 0x762   : > { %v1973_v27 = vpop.f32.mrf.mxu0 }
 0x764   : > { %v1335_v28 = vpop.f32.mrf.mxu0 }
 0x766   : > { %v1974_v29 = vpop.f32.mrf.mxu0 }
 0x7d3   : > { %v1378_v34 = vpop.f32.mrf.mxu1 }
 0x7d4   : > { %1477 = vrot.lane.b32.xlu0 %v1378_v34, %s2545_s24 }
 0x7d5   : > { %v1979_v35 = vpop.f32.mrf.mxu1 }
 0x7d7   : > { %v1381_v36 = vpop.f32.mrf.mxu1 }
 0x7d9   : > { %v1980_v37 = vpop.f32.mrf.mxu1 }
 0x7db   : > { %v1424_v38 = vpop.f32.mrf.mxu0 }
 0x7dc   : > { %1481 = vrot.lane.b32.xlu1 %v1424_v38, %s2546_s3 }
 0x7dd   : > { %v1985_v39 = vpop.f32.mrf.mxu0 }
 0x7df   : > { %v1427_v40 = vpop.f32.mrf.mxu0 }
 0x7e1   : > { %v1986_v41 = vpop.f32.mrf.mxu0 }
 0x7e3   : > { %v1470_v42 = vpop.f32.mrf.mxu1 }
 0x7e4   : > { %1485 = vrot.lane.b32.xlu1 %v1470_v42, %s2547_s12 }
 0x7e5   : > { %v1991_v14 = vpop.f32.mrf.mxu1 }
 0x7e7   : > { %v1473_v43 = vpop.f32.mrf.mxu1 }
 0x7e9   : > { %v1992_v44 = vpop.f32.mrf.mxu1 }
 0x846   : > { %v1478_v45 = vpop.permute.xlu0 %1477 }
 0x847   : > { %v1488_v47 = vsel %vm1054_vm8, %v1332_v26, %v1478_v45 }
 0x84e   : > { %v1482_v46 = vpop.permute.xlu1 %1481 }
 0x84f   : > { %v1490_v48 = vsel %vm1489_vm10, %v1488_v47, %v1482_v46 }
 0x856   : > { %v1486_v49 = vpop.permute.xlu1 %1485 }
 0x857   : > { %v1492_v50 = vsel %vm1491_vm11, %v1490_v48, %v1486_v49 }
 0x858   : > { %v1493_v51 = vadd.f32 %v1492_v50, %v2991_v7 }
 0x85a   : > { %v1494_v52 = vpack.c.bf16 %v1493_v51, %v1493_v51 }
 0x85c   : > { %1998 = vmatmul.mubr.msk.bf16.vlgmr.msra.gmra.mxu0 %vm739_vm3, %v1494_v52 }
 0x91c   : > { %v1552_v53 = vpop.f32.mrf.mxu0 }
 0x91d   : > { %v1558_v54 = vmax.f32 %v1552_v53, 0.0 }
 0x91e   : > { %v1999_v55 = vpop.f32.mrf.mxu0  ;;  %1564 = sbr.rel (%p1861_p9) target bundleno = 2340 (0x924), region = 108 }
 0x91f   : > { %v1559_v56 = vadd.f32 %v1558_v54, %v1493_v51 }
 0x920   : > { %v1555_v57 = vpop.f32.mrf.mxu0 }
 0x921   : > { %1560 = vst.msk [vmem:[#allocation2] sm:$0xff] %vm739_vm3, %v1559_v56 }
 0x922   : > { %v2000_v58 = vpop.f32.mrf.mxu0 }
 0x923   : > { %1565 = vst.msk [vmem:[%s2921_s15] sm:$0xff] %vm739_vm3, %v1559_v56 }
 0x924 PF: > { %s3224_s13 = sld [smem:[#allocation28_spill]]  ;;  %s1581_s30 = sshll.u32 %s2921_s15, 4  ;;  %s1582_s30 = int_to_ptr.vmem [resolvable:$true] %s1581_s30 }
 0x925   : > { %s3226_s17 = sld [smem:[#allocation45_spill]]  ;;  %s1567_s7 = scalar_lea.sflag [#allocation8], %s2876_s9 }
 0x926   : > { %s2393_s14 = scalar_lea.vmem %s1582_s30, 128  ;;  %s2548_s11 = smov [#allocation18]  }
 0x927   : > { %p2394_p0 = scmp.ne.s32.totalorder %s1582_s30, %s2393_s14  ;;  %s2397_s8 = sshll.u32 %s2548_s11, 4  ;;  %s2398_s8 = int_to_ptr.vmem [resolvable:$false] %s2397_s8 }
 0x928   : > { %s2399_s24 = scalar_lea.vmem %s2398_s8, 256  ;;  %p2400_p1 = scmp.lt.s32.totalorder %s1582_s30, %s2398_s8 }
 0x929   : > { %p2395_p7 = pnand %p2394_p0, %p2710_p13  ;;  %p2401_p2 = scmp.lt.s32.totalorder %s2399_s24, %s2393_s14 }
 0x92a   : > { %s1863_s18 = sshll.u32 %s3224_s13, 7 }
 0x92b   : > { %s3227_s1 = smov %s3226_s17  ;;  %s1579_s5 = scalar_lea.hbm %s3226_s17, %s1863_s18 }
 0x92c   : > { %p2396_p8 = pneg %p2395_p7  ;;  %p2402_p10 = por %p2401_p2, %p2400_p1 }
 0x92e   : > { %p2403_p5 = pnand %p2402_p10, %p2396_p8 }
 0x930   : > { %2406 = shalt.err (!%p2403_p5)
}
 0x931   : > { %s2407_s3 = scalar_lea.hbm %s1579_s5, 128  ;;  %s2411_s12 = scalar_lea.hbm %s3227_s1, 256 }
 0x932   : > { %p2408_p4 = scmp.ne.s32.totalorder %s1579_s5, %s2407_s3  ;;  %p2412_p12 = scmp.lt.s32.totalorder %s1579_s5, %s3227_s1 }
 0x933   : > { %p2413_p9 = scmp.lt.s32.totalorder %s2411_s12, %s2407_s3 }
 0x934   : > { %p2409_p3 = pnand %p2408_p4, %p2710_p13 }
 0x935   : > { %p2414_p0 = por %p2413_p9, %p2412_p12 }
 0x936   : > { %p2410_p11 = pneg %p2409_p3 }
 0x938   : > { %p2415_p7 = pnand %p2414_p0, %p2410_p11 }
 0x93a   : > { %2418 = shalt.err (!%p2415_p7)
}
 0x93b   : > { %2019 = dma.vmem_to_hbm [thread:$0]  (%p2710_p13), %s1582_s30, 128, %s1579_s5, %s1567_s7  }
 0x93c PF: > { %s3228_s18 = sld [smem:[#allocation25_spill]]  ;;  %p2053_p8 = scmp.ge.s32.totalorder %s2525_s27, 2 }
 0x93e   : > { %p2045_p1 = pnand %p2053_p8, %p2726_p6 }
 0x940   : > { %p2046_p2 = pneg %p2045_p1 }
 0x942   : > { %s1593_s4 = sand.u32 1, %s3228_s18  }
 0x943   : > { %s1594_s17 = scalar_lea.sflag [#allocation8], %s1593_s4 }
 0x944   : > { %2480 = dma.done.wait (%p2046_p2), %s1594_s17, 128  }
 0x945   : > { %2482 = vsyncadd (%p2046_p2), %s1594_s17, 4294967168  ;;  %s34_s27 = sadd.s32 1, %s2525_s27   ;;  %s3230_s17 = sld [smem:[#allocation24_spill]] }
 0x946   : > { %p31_p10 = scmp.ge.s32.totalorder %s34_s27, 6   ;;  %s3231_s16 = sld [smem:[#allocation26_spill]] }
 0x947   : > { %s3232_s5 = smov %s2800_s21  ;;  %s3233_s24 = sld [smem:[#allocation29_spill]] }
 0x948   : > { %s3234_s30 = sld [smem:[#allocation36_spill]]  ;;  %s3236_s18 = smov %s2493_s19 }
 0x949   : > { %s3235_s26 = sld [smem:[#allocation37_spill]]  ;;  %s3237_s19 = smov %s2793_s28 }
 0x94a   : > { %s3239_s21 = smov %s2505_s22  ;;  %s3240_s22 = smov %s3232_s5 }
 0x94b   : > { %s3241_s23 = smov %s2517_s25  ;;  %33 = sbr.rel (!%p31_p10) target bundleno = 23 (0x17), region = 189 }
 0x94c   : > { %3238 = sst [smem:[#allocation24_spill]] %s3231_s16 }
 0x94e   : > { %s3242_s25 = smov %s3234_s30 }
 0x950   :  { %1599 = vsyncpa [#allocation7], 1 }
 0x951   :  { %1601 = vsyncpa [#allocation7 + $0x1], 1 }
 0x952   :  { %1602 = vsyncpa [#allocation10], 1 }
 0x953   :  { %1604 = vsyncpa [#allocation10 + $0x1], 1 }
 0x954   :  { %1605 = vsyncpa [#allocation13], 1 }
 0x955   :  { %1606 = vsyncpa [#allocation16], 1 }
 0x956   :  { %1608 = vsyncpa [#allocation16 + $0x1], 1 }
 0x957   :  { %1609 = vsyncpa [#allocation8], 1 }
 0x958   :  { %1611 = vsyncpa [#allocation8 + $0x1], 1 }

</bundles_post_ra>
